<compile_context>
chip_gen: v5e
topology: v5e:2x2
jax: 0.10.0
libtpu: 0.0.40
codegen_flags: <defaults>
</compile_context>

<pallas_src>
import jax
import jax.numpy as jnp
from jax.experimental import pallas as pl
from jax.experimental.pallas import tpu as pltpu

BN_EPS = 1e-5


def gnn_block_kernel(
    eps_ref,    # (1, 1)   SMEM  GIN eps
    tgt_ref,    # (1, tE)  VMEM  int32 target node index per edge (-1 = pad)
    msg_ref,    # (tE, D)  bf16  relu(x[src] + edge_emb), pre-fused in wrapper
    x_ref,      # (N, D)   f32   node features (grid-invariant)
    w1_ref,     # (D, H)   bf16  mlp Linear 1 weight (in, out)
    b1_ref,     # (1, H)   f32
    g1_ref,     # (1, H)   f32   mlp BatchNorm gamma
    be1_ref,    # (1, H)   f32   mlp BatchNorm beta
    w2_ref,     # (H, D)   bf16  mlp Linear 2 weight
    b2_ref,     # (1, D)   f32
    g2_ref,     # (1, D)   f32   final BatchNorm gamma
    be2_ref,    # (1, D)   f32   final BatchNorm beta
    out_ref,    # (N, D)   f32   doubles as the scatter-add accumulator
):
    k = pl.program_id(0)

    @pl.when(k == 0)
    def _init():
        out_ref[...] = jnp.zeros_like(out_ref)

    # --- aggr='add' scatter via one-hot built on-chip from target indices ---
    n = out_ref.shape[0]
    te = tgt_ref.shape[1]
    node_ids = jax.lax.broadcasted_iota(jnp.int32, (n, te), 0)
    onehot = (node_ids == tgt_ref[...]).astype(jnp.bfloat16)   # exact 0/1

    out_ref[...] += jnp.dot(onehot, msg_ref[...],
                            preferred_element_type=jnp.float32)

    @pl.when(k == pl.num_programs(0) - 1)
    def _epilogue():
        inv_n = 1.0 / jnp.float32(n)
        eps = eps_ref[0, 0]

        # (1 + eps) * x + aggr   (aggr currently lives in out_ref)
        h = (1.0 + eps) * x_ref[...] + out_ref[...]

        # MLP: Linear(D, 2D) -> BatchNorm1d(2D, batch stats) -> ReLU
        z = jnp.dot(h.astype(jnp.bfloat16), w1_ref[...],
                    preferred_element_type=jnp.float32) + b1_ref[...]
        mu1 = jnp.sum(z, axis=0, keepdims=True) * inv_n
        zc = z - mu1                                    # two-pass variance
        var1 = jnp.sum(zc * zc, axis=0, keepdims=True) * inv_n
        z = zc * jax.lax.rsqrt(var1 + BN_EPS) * g1_ref[...] + be1_ref[...]
        z = jnp.maximum(z, 0.0)

        # Linear(2D, D)
        y = jnp.dot(z.astype(jnp.bfloat16), w2_ref[...],
                    preferred_element_type=jnp.float32) + b2_ref[...]

        # GNNBlock.norm: BatchNorm1d(D, batch stats)
        mu2 = jnp.sum(y, axis=0, keepdims=True) * inv_n
        yc = y - mu2
        var2 = jnp.sum(yc * yc, axis=0, keepdims=True) * inv_n
        y = yc * jax.lax.rsqrt(var2 + BN_EPS) * g2_ref[...] + be2_ref[...]

        # last_act=False -> no relu; dropout p=0 -> identity; residual=False
        out_ref[...] = y


def gnn_block_forward(params, x, edge_index, edge_attr, *, edge_tile=512):
    """Glue (self-loops, bond-encoder lookup, source gather, message fusion,
    edge padding) in JAX; all heavy compute (scatter-add, MLP matmuls,
    BatchNorms) in Pallas."""
    n, d = x.shape
    h_dim = params["w1"].shape[1]

    # add_self_loops: append (i, i) edges with bond attr [5, 7, 0]
    loop_idx = jnp.arange(n, dtype=edge_index.dtype)
    edge_index = jnp.concatenate(
        [edge_index, jnp.stack([loop_idx, loop_idx], axis=0)], axis=1)
    self_loop_attr = jnp.zeros((n, 3), dtype=edge_attr.dtype)
    self_loop_attr = self_loop_attr.at[:, 0].set(5).at[:, 1].set(7)
    edge_attr = jnp.concatenate([edge_attr, self_loop_attr], axis=0)

    # BondEncoder: sum of per-feature embedding lookups (gather = glue)
    e0, e1, e2 = params["bond_emb"]
    edge_emb = (e0[edge_attr[:, 0]] + e1[edge_attr[:, 1]]
                + e2[edge_attr[:, 2]]).astype(jnp.float32)

    src, tgt = edge_index[0], edge_index[1]

    # GINConv.message pre-fused (gather+add+relu+cast fuse in XLA): single
    # bf16 stream into the kernel instead of two f32 streams.
    msg = jnp.maximum(x[src].astype(jnp.float32) + edge_emb, 0.0)
    msg = msg.astype(jnp.bfloat16)                            # (E_total, D)

    # pad edges to a multiple of edge_tile; padded edges get tgt = -1
    e_tot = msg.shape[0]
    e_pad = pl.cdiv(e_tot, edge_tile) * edge_tile
    pad = e_pad - e_tot
    msg = jnp.pad(msg, ((0, pad), (0, 0)))
    tgt = jnp.pad(tgt.astype(jnp.int32), (0, pad), constant_values=-1)
    tgt = tgt.reshape(1, e_pad)

    grid = (e_pad // edge_tile,)
    invariant = lambda k: (0, 0)   # resident across the edge-reduction axis

    flops = 2 * n * e_pad * d + 2 * n * d * h_dim + 2 * n * h_dim * d
    bytes_accessed = (e_pad * d * 2 + e_pad * 4      # bf16 msg stream + tgt
                      + 2 * n * d * 4                 # x + out
                      + 2 * d * h_dim * 2             # bf16 weights
                      + 3 * (h_dim + d) * 4)          # BN / bias vectors

    out = pl.pallas_call(
        gnn_block_kernel,
        out_shape=jax.ShapeDtypeStruct((n, d), jnp.float32),
        grid_spec=pltpu.PrefetchScalarGridSpec(
            num_scalar_prefetch=0,
            grid=grid,
            in_specs=[
                pl.BlockSpec(memory_space=pltpu.MemorySpace.SMEM),   # eps
                pl.BlockSpec((1, edge_tile), lambda k: (0, k)),      # tgt
                pl.BlockSpec((edge_tile, d), lambda k: (k, 0)),      # msg
                pl.BlockSpec((n, d), invariant),                     # x
                pl.BlockSpec((d, h_dim), invariant),                 # w1
                pl.BlockSpec((1, h_dim), invariant),                 # b1
                pl.BlockSpec((1, h_dim), invariant),                 # g1
                pl.BlockSpec((1, h_dim), invariant),                 # be1
                pl.BlockSpec((h_dim, d), invariant),                 # w2
                pl.BlockSpec((1, d), invariant),                     # b2
                pl.BlockSpec((1, d), invariant),                     # g2
                pl.BlockSpec((1, d), invariant),                     # be2
            ],
            out_specs=pl.BlockSpec((n, d), invariant),
        ),
        compiler_params=pltpu.CompilerParams(
            dimension_semantics=("arbitrary",),
            vmem_limit_bytes=32 * 1024 * 1024,   # fits v5e/v6e/v7x scoped VMEM
        ),
        cost_estimate=pl.CostEstimate(
            flops=flops, transcendentals=h_dim + d,
            bytes_accessed=bytes_accessed),
    )(
        params["eps"], tgt, msg, x.astype(jnp.float32),
        params["w1"], params["b1"], params["g1"], params["be1"],
        params["w2"], params["b2"], params["g2"], params["be2"],
    )
    return out


def reference_forward(params, x, edge_index, edge_attr):
    """Pure-JAX f32 reference mirroring the PyTorch forward (for validation).
    Uses the same (bf16-stored) weights upcast to f32."""
    n = x.shape[0]
    loop_idx = jnp.arange(n, dtype=edge_index.dtype)
    edge_index = jnp.concatenate(
        [edge_index, jnp.stack([loop_idx, loop_idx], axis=0)], axis=1)
    self_loop_attr = jnp.zeros((n, 3), dtype=edge_attr.dtype)
    self_loop_attr = self_loop_attr.at[:, 0].set(5).at[:, 1].set(7)
    edge_attr = jnp.concatenate([edge_attr, self_loop_attr], axis=0)
    e0, e1, e2 = params["bond_emb"]
    edge_emb = e0[edge_attr[:, 0]] + e1[edge_attr[:, 1]] + e2[edge_attr[:, 2]]
    src, tgt = edge_index[0], edge_index[1]
    msg = jnp.maximum(x[src] + edge_emb, 0.0)
    aggr = jnp.zeros_like(x).at[tgt].add(msg)
    h = (1.0 + params["eps"][0, 0]) * x + aggr
    w1 = params["w1"].astype(jnp.float32)
    w2 = params["w2"].astype(jnp.float32)
    z = h @ w1 + params["b1"]
    mu, var = jnp.mean(z, 0, keepdims=True), jnp.var(z, 0, keepdims=True)
    z = (z - mu) * jax.lax.rsqrt(var + BN_EPS) * params["g1"] + params["be1"]
    z = jnp.maximum(z, 0.0)
    y = z @ w2 + params["b2"]
    mu, var = jnp.mean(y, 0, keepdims=True), jnp.var(y, 0, keepdims=True)
    y = (y - mu) * jax.lax.rsqrt(var + BN_EPS) * params["g2"] + params["be2"]
    return y


def init_params(key, embed_dim):
    h = 2 * embed_dim
    ks = jax.random.split(key, 7)
    # bond encoder tables (3 categorical features; sizes cover values 5/7/0)
    bond_emb = (
        0.1 * jax.random.normal(ks[0], (8, embed_dim), jnp.float32),
        0.1 * jax.random.normal(ks[1], (8, embed_dim), jnp.float32),
        0.1 * jax.random.normal(ks[2], (4, embed_dim), jnp.float32),
    )
    params = {
        "bond_emb": bond_emb,
        "eps": jnp.zeros((1, 1), jnp.float32),                # GIN eps init 0
        # weights stored bf16: halves weight DMA, native MXU operand dtype
        "w1": (0.1 * jax.random.normal(ks[3], (embed_dim, h), jnp.float32)
               ).astype(jnp.bfloat16),
        "b1": 0.01 * jax.random.normal(ks[4], (1, h), jnp.float32),
        "g1": jnp.ones((1, h), jnp.float32),
        "be1": jnp.zeros((1, h), jnp.float32),
        "w2": (0.1 * jax.random.normal(ks[5], (h, embed_dim), jnp.float32)
               ).astype(jnp.bfloat16),
        "b2": 0.01 * jax.random.normal(ks[6], (1, embed_dim), jnp.float32),
        "g2": jnp.ones((1, embed_dim), jnp.float32),
        "be2": jnp.zeros((1, embed_dim), jnp.float32),
    }
    return params


if __name__ == "__main__":
    key = jax.random.PRNGKey(0)
    k_x, k_ei, k_ea, k_p = jax.random.split(key, 4)

    # lane-dense small shapes: N multiple of 8, D = 128 (lane width)
    N, E, D = 64, 200, 128   # nodes, edges (pre self-loop), embed_dim

    x = jax.random.normal(k_x, (N, D), jnp.float32)
    edge_index = jax.random.randint(k_ei, (2, E), 0, N, dtype=jnp.int32)
    edge_attr = jnp.stack(
        [
            jax.random.randint(k_ea, (E,), 0, 5, dtype=jnp.int32),
            jax.random.randint(jax.random.fold_in(k_ea, 1), (E,), 0, 6, dtype=jnp.int32),
            jax.random.randint(jax.random.fold_in(k_ea, 2), (E,), 0, 2, dtype=jnp.int32),
        ],
        axis=1,
    )  # (E, 3)

    params = init_params(k_p, D)

    out = gnn_block_forward(params, x, edge_index, edge_attr)
    out = jax.block_until_ready(out)

    ref = reference_forward(params, x, edge_index, edge_attr)
    assert out.shape == (N, D)
    # bf16 MXU operands vs. f32 reference -> allow ~2e-2 absolute slack
    assert jnp.allclose(out, ref, atol=2e-2, rtol=2e-2), "mismatch vs JAX reference"

    print("KERNEL_OK")
</pallas_src>

<mosaic_0001>
module attributes {stable_mosaic.version = 11 : i64} {
  func.func @gnn_block_kernel(%arg0: i32, %arg1: memref<1x1xf32, #tpu.memory_space<smem>>, %arg2: memref<1x512xi32, #tpu.memory_space<vmem>>, %arg3: memref<512x128xbf16, #tpu.memory_space<vmem>>, %arg4: memref<64x128xf32, #tpu.memory_space<vmem>>, %arg5: memref<128x256xbf16, #tpu.memory_space<vmem>>, %arg6: memref<1x256xf32, #tpu.memory_space<vmem>>, %arg7: memref<1x256xf32, #tpu.memory_space<vmem>>, %arg8: memref<1x256xf32, #tpu.memory_space<vmem>>, %arg9: memref<256x128xbf16, #tpu.memory_space<vmem>>, %arg10: memref<1x128xf32, #tpu.memory_space<vmem>>, %arg11: memref<1x128xf32, #tpu.memory_space<vmem>>, %arg12: memref<1x128xf32, #tpu.memory_space<vmem>>, %arg13: memref<64x128xf32, #tpu.memory_space<vmem>>) attributes {dimension_semantics = [#tpu.dimension_semantics<arbitrary>], iteration_bounds = array<i64: 1>, scalar_prefetch = 0 : i64, scratch_operands = 0 : i64, tpu.core_type = #tpu.core_type<tc>, window_params = [{transform_indices = @transform_0, window_bounds = array<i64: 1, 1>}, {transform_indices = @transform_1, window_bounds = array<i64: 1, 512>}, {transform_indices = @transform_2, window_bounds = array<i64: 512, 128>}, {pipeline_mode = #tpu.pipeline_mode<synchronous>, transform_indices = @transform_3, window_bounds = array<i64: 64, 128>}, {pipeline_mode = #tpu.pipeline_mode<synchronous>, transform_indices = @transform_4, window_bounds = array<i64: 128, 256>}, {pipeline_mode = #tpu.pipeline_mode<synchronous>, transform_indices = @transform_5, window_bounds = array<i64: 1, 256>}, {pipeline_mode = #tpu.pipeline_mode<synchronous>, transform_indices = @transform_6, window_bounds = array<i64: 1, 256>}, {pipeline_mode = #tpu.pipeline_mode<synchronous>, transform_indices = @transform_7, window_bounds = array<i64: 1, 256>}, {pipeline_mode = #tpu.pipeline_mode<synchronous>, transform_indices = @transform_8, window_bounds = array<i64: 256, 128>}, {pipeline_mode = #tpu.pipeline_mode<synchronous>, transform_indices = @transform_9, window_bounds = array<i64: 1, 128>}, {pipeline_mode = #tpu.pipeline_mode<synchronous>, transform_indices = @transform_10, window_bounds = array<i64: 1, 128>}, {pipeline_mode = #tpu.pipeline_mode<synchronous>, transform_indices = @transform_11, window_bounds = array<i64: 1, 128>}, {pipeline_mode = #tpu.pipeline_mode<synchronous>, transform_indices = @transform_12, window_bounds = array<i64: 64, 128>}]} {
    %c0_i32 = arith.constant 0 : i32
    %0 = arith.cmpi eq, %arg0, %c0_i32 : i32
    %1 = arith.extui %0 : i1 to i32
    %c0_i32_0 = arith.constant 0 : i32
    %2 = arith.cmpi ne, %1, %c0_i32_0 : i32
    scf.if %2 {
      %cst_10 = arith.constant 0.000000e+00 : f32
      %18 = vector.broadcast %cst_10 : f32 to vector<64x128xf32>
      %c0_11 = arith.constant 0 : index
      %c0_12 = arith.constant 0 : index
      %19 = vector.load %arg13[%c0_11, %c0_12] : memref<64x128xf32, #tpu.memory_space<vmem>>, vector<64x128xf32>
      tpu.vector_store %arg13[%c0_11, %c0_12], %18 {strides = array<i32>} : memref<64x128xf32, #tpu.memory_space<vmem>>, vector<64x128xf32>,
    } else {
    }
    %3 = tpu.iota {dimensions = array<i32: 0>} : vector<64x512xi32>
    %c0 = arith.constant 0 : index
    %c0_1 = arith.constant 0 : index
    %4 = vector.load %arg2[%c0, %c0_1] : memref<1x512xi32, #tpu.memory_space<vmem>>, vector<1x512xi32>
    %5 = vector.broadcast %4 : vector<1x512xi32> to vector<64x512xi32>
    %6 = arith.cmpi eq, %3, %5 : vector<64x512xi32>
    %7 = arith.extui %6 : vector<64x512xi1> to vector<64x512xi32>
    %8 = arith.sitofp %7 : vector<64x512xi32> to vector<64x512xf32>
    %9 = arith.truncf %8 : vector<64x512xf32> to vector<64x512xbf16>
    %c0_2 = arith.constant 0 : index
    %c0_3 = arith.constant 0 : index
    %10 = vector.load %arg13[%c0_2, %c0_3] : memref<64x128xf32, #tpu.memory_space<vmem>>, vector<64x128xf32>
    %c0_4 = arith.constant 0 : index
    %c0_5 = arith.constant 0 : index
    %11 = vector.load %arg3[%c0_4, %c0_5] : memref<512x128xbf16, #tpu.memory_space<vmem>>, vector<512x128xbf16>
    %cst = arith.constant dense<0.000000e+00> : vector<64x128xf32>
    %12 = tpu.matmul %9, %11, %cst {dimension_numbers = #tpu.dot_dimension_numbers<[1], [0], [0], [1], [0, 0, 1, 1], [], []>} : vector<64x512xbf16>, vector<512x128xbf16>, vector<64x128xf32> -> vector<64x128xf32>
    %13 = arith.addf %10, %12 : vector<64x128xf32>
    %c0_6 = arith.constant 0 : index
    %c0_7 = arith.constant 0 : index
    %14 = vector.load %arg13[%c0_6, %c0_7] : memref<64x128xf32, #tpu.memory_space<vmem>>, vector<64x128xf32>
    tpu.vector_store %arg13[%c0_6, %c0_7], %13 {strides = array<i32>} : memref<64x128xf32, #tpu.memory_space<vmem>>, vector<64x128xf32>,
    %c0_i32_8 = arith.constant 0 : i32
    %15 = arith.cmpi eq, %arg0, %c0_i32_8 : i32
    %16 = arith.extui %15 : i1 to i32
    %c0_i32_9 = arith.constant 0 : i32
    %17 = arith.cmpi ne, %16, %c0_i32_9 : i32
    scf.if %17 {
      %cst_10 = arith.constant 1.000000e+00 : f32
      %cst_11 = arith.constant 6.400000e+01 : f32
      %18 = arith.divf %cst_10, %cst_11 : f32
      %c0_12 = arith.constant 0 : index
      %c0_13 = arith.constant 0 : index
      %19 = memref.load %arg1[%c0_12, %c0_13] : memref<1x1xf32, #tpu.memory_space<smem>>
      %cst_14 = arith.constant 1.000000e+00 : f32
      %20 = arith.addf %cst_14, %19 : f32
      %c0_15 = arith.constant 0 : index
      %c0_16 = arith.constant 0 : index
      %21 = vector.load %arg4[%c0_15, %c0_16] : memref<64x128xf32, #tpu.memory_space<vmem>>, vector<64x128xf32>
      %22 = vector.broadcast %20 : f32 to vector<64x128xf32>
      %23 = arith.mulf %22, %21 : vector<64x128xf32>
      %c0_17 = arith.constant 0 : index
      %c0_18 = arith.constant 0 : index
      %24 = vector.load %arg13[%c0_17, %c0_18] : memref<64x128xf32, #tpu.memory_space<vmem>>, vector<64x128xf32>
      %25 = arith.addf %23, %24 : vector<64x128xf32>
      %26 = arith.truncf %25 : vector<64x128xf32> to vector<64x128xbf16>
      %c0_19 = arith.constant 0 : index
      %c0_20 = arith.constant 0 : index
      %27 = vector.load %arg5[%c0_19, %c0_20] : memref<128x256xbf16, #tpu.memory_space<vmem>>, vector<128x256xbf16>
      %cst_21 = arith.constant dense<0.000000e+00> : vector<64x256xf32>
      %28 = tpu.matmul %26, %27, %cst_21 {dimension_numbers = #tpu.dot_dimension_numbers<[1], [0], [0], [1], [0, 0, 1, 1], [], []>} : vector<64x128xbf16>, vector<128x256xbf16>, vector<64x256xf32> -> vector<64x256xf32>
      %c0_22 = arith.constant 0 : index
      %c0_23 = arith.constant 0 : index
      %29 = vector.load %arg6[%c0_22, %c0_23] : memref<1x256xf32, #tpu.memory_space<vmem>>, vector<1x256xf32>
      %30 = vector.broadcast %29 : vector<1x256xf32> to vector<64x256xf32>
      %31 = arith.addf %28, %30 : vector<64x256xf32>
      %cst_24 = arith.constant dense<0.000000e+00> : vector<256xf32>
      %32 = vector.multi_reduction <add>, %31, %cst_24 [0] : vector<64x256xf32> to vector<256xf32>
      %33 = vector.shape_cast %32 : vector<256xf32> to vector<1x256xf32>
      %34 = vector.broadcast %18 : f32 to vector<1x256xf32>
      %35 = arith.mulf %33, %34 : vector<1x256xf32>
      %36 = vector.broadcast %35 : vector<1x256xf32> to vector<64x256xf32>
      %37 = arith.subf %31, %36 : vector<64x256xf32>
      %38 = arith.mulf %37, %37 : vector<64x256xf32>
      %cst_25 = arith.constant dense<0.000000e+00> : vector<256xf32>
      %39 = vector.multi_reduction <add>, %38, %cst_25 [0] : vector<64x256xf32> to vector<256xf32>
      %40 = vector.shape_cast %39 : vector<256xf32> to vector<1x256xf32>
      %41 = vector.broadcast %18 : f32 to vector<1x256xf32>
      %42 = arith.mulf %40, %41 : vector<1x256xf32>
      %cst_26 = arith.constant 9.99999974E-6 : f32
      %43 = vector.broadcast %cst_26 : f32 to vector<1x256xf32>
      %44 = arith.addf %42, %43 : vector<1x256xf32>
      %45 = math.rsqrt %44 : vector<1x256xf32>
      %46 = vector.broadcast %45 : vector<1x256xf32> to vector<64x256xf32>
      %47 = arith.mulf %37, %46 : vector<64x256xf32>
      %c0_27 = arith.constant 0 : index
      %c0_28 = arith.constant 0 : index
      %48 = vector.load %arg7[%c0_27, %c0_28] : memref<1x256xf32, #tpu.memory_space<vmem>>, vector<1x256xf32>
      %49 = vector.broadcast %48 : vector<1x256xf32> to vector<64x256xf32>
      %50 = arith.mulf %47, %49 : vector<64x256xf32>
      %c0_29 = arith.constant 0 : index
      %c0_30 = arith.constant 0 : index
      %51 = vector.load %arg8[%c0_29, %c0_30] : memref<1x256xf32, #tpu.memory_space<vmem>>, vector<1x256xf32>
      %52 = vector.broadcast %51 : vector<1x256xf32> to vector<64x256xf32>
      %53 = arith.addf %50, %52 : vector<64x256xf32>
      %cst_31 = arith.constant 0.000000e+00 : f32
      %54 = vector.broadcast %cst_31 : f32 to vector<64x256xf32>
      %55 = arith.maximumf %53, %54 : vector<64x256xf32>
      %56 = arith.truncf %55 : vector<64x256xf32> to vector<64x256xbf16>
      %c0_32 = arith.constant 0 : index
      %c0_33 = arith.constant 0 : index
      %57 = vector.load %arg9[%c0_32, %c0_33] : memref<256x128xbf16, #tpu.memory_space<vmem>>, vector<256x128xbf16>
      %cst_34 = arith.constant dense<0.000000e+00> : vector<64x128xf32>
      %58 = tpu.matmul %56, %57, %cst_34 {dimension_numbers = #tpu.dot_dimension_numbers<[1], [0], [0], [1], [0, 0, 1, 1], [], []>} : vector<64x256xbf16>, vector<256x128xbf16>, vector<64x128xf32> -> vector<64x128xf32>
      %c0_35 = arith.constant 0 : index
      %c0_36 = arith.constant 0 : index
      %59 = vector.load %arg10[%c0_35, %c0_36] : memref<1x128xf32, #tpu.memory_space<vmem>>, vector<1x128xf32>
      %60 = vector.broadcast %59 : vector<1x128xf32> to vector<64x128xf32>
      %61 = arith.addf %58, %60 : vector<64x128xf32>
      %cst_37 = arith.constant dense<0.000000e+00> : vector<128xf32>
      %62 = vector.multi_reduction <add>, %61, %cst_37 [0] : vector<64x128xf32> to vector<128xf32>
      %63 = vector.shape_cast %62 : vector<128xf32> to vector<1x128xf32>
      %64 = vector.broadcast %18 : f32 to vector<1x128xf32>
      %65 = arith.mulf %63, %64 : vector<1x128xf32>
      %66 = vector.broadcast %65 : vector<1x128xf32> to vector<64x128xf32>
      %67 = arith.subf %61, %66 : vector<64x128xf32>
      %68 = arith.mulf %67, %67 : vector<64x128xf32>
      %cst_38 = arith.constant dense<0.000000e+00> : vector<128xf32>
      %69 = vector.multi_reduction <add>, %68, %cst_38 [0] : vector<64x128xf32> to vector<128xf32>
      %70 = vector.shape_cast %69 : vector<128xf32> to vector<1x128xf32>
      %71 = vector.broadcast %18 : f32 to vector<1x128xf32>
      %72 = arith.mulf %70, %71 : vector<1x128xf32>
      %cst_39 = arith.constant 9.99999974E-6 : f32
      %73 = vector.broadcast %cst_39 : f32 to vector<1x128xf32>
      %74 = arith.addf %72, %73 : vector<1x128xf32>
      %75 = math.rsqrt %74 : vector<1x128xf32>
      %76 = vector.broadcast %75 : vector<1x128xf32> to vector<64x128xf32>
      %77 = arith.mulf %67, %76 : vector<64x128xf32>
      %c0_40 = arith.constant 0 : index
      %c0_41 = arith.constant 0 : index
      %78 = vector.load %arg11[%c0_40, %c0_41] : memref<1x128xf32, #tpu.memory_space<vmem>>, vector<1x128xf32>
      %79 = vector.broadcast %78 : vector<1x128xf32> to vector<64x128xf32>
      %80 = arith.mulf %77, %79 : vector<64x128xf32>
      %c0_42 = arith.constant 0 : index
      %c0_43 = arith.constant 0 : index
      %81 = vector.load %arg12[%c0_42, %c0_43] : memref<1x128xf32, #tpu.memory_space<vmem>>, vector<1x128xf32>
      %82 = vector.broadcast %81 : vector<1x128xf32> to vector<64x128xf32>
      %83 = arith.addf %80, %82 : vector<64x128xf32>
      %c0_44 = arith.constant 0 : index
      %c0_45 = arith.constant 0 : index
      %84 = vector.load %arg13[%c0_44, %c0_45] : memref<64x128xf32, #tpu.memory_space<vmem>>, vector<64x128xf32>
      tpu.vector_store %arg13[%c0_44, %c0_45], %83 {strides = array<i32>} : memref<64x128xf32, #tpu.memory_space<vmem>>, vector<64x128xf32>,
    } else {
    }
    return
  }
  func.func @transform_0(%arg0: i32) -> (i32, i32) {
    %c0_i32 = arith.constant 0 : i32
    %c0_i32_0 = arith.constant 0 : i32
    %c0_i32_1 = arith.constant 0 : i32
    return %c0_i32, %c0_i32_0 : i32, i32
  }
  func.func @transform_1(%arg0: i32) -> (i32, i32) {
    %c0_i32 = arith.constant 0 : i32
    %c0_i32_0 = arith.constant 0 : i32
    return %c0_i32, %arg0 : i32, i32
  }
  func.func @transform_2(%arg0: i32) -> (i32, i32) {
    %c0_i32 = arith.constant 0 : i32
    %c0_i32_0 = arith.constant 0 : i32
    return %arg0, %c0_i32 : i32, i32
  }
  func.func @transform_3(%arg0: i32) -> (i32, i32) {
    %c0_i32 = arith.constant 0 : i32
    %c0_i32_0 = arith.constant 0 : i32
    %c0_i32_1 = arith.constant 0 : i32
    return %c0_i32, %c0_i32_0 : i32, i32
  }
  func.func @transform_4(%arg0: i32) -> (i32, i32) {
    %c0_i32 = arith.constant 0 : i32
    %c0_i32_0 = arith.constant 0 : i32
    %c0_i32_1 = arith.constant 0 : i32
    return %c0_i32, %c0_i32_0 : i32, i32
  }
  func.func @transform_5(%arg0: i32) -> (i32, i32) {
    %c0_i32 = arith.constant 0 : i32
    %c0_i32_0 = arith.constant 0 : i32
    %c0_i32_1 = arith.constant 0 : i32
    return %c0_i32, %c0_i32_0 : i32, i32
  }
  func.func @transform_6(%arg0: i32) -> (i32, i32) {
    %c0_i32 = arith.constant 0 : i32
    %c0_i32_0 = arith.constant 0 : i32
    %c0_i32_1 = arith.constant 0 : i32
    return %c0_i32, %c0_i32_0 : i32, i32
  }
  func.func @transform_7(%arg0: i32) -> (i32, i32) {
    %c0_i32 = arith.constant 0 : i32
    %c0_i32_0 = arith.constant 0 : i32
    %c0_i32_1 = arith.constant 0 : i32
    return %c0_i32, %c0_i32_0 : i32, i32
  }
  func.func @transform_8(%arg0: i32) -> (i32, i32) {
    %c0_i32 = arith.constant 0 : i32
    %c0_i32_0 = arith.constant 0 : i32
    %c0_i32_1 = arith.constant 0 : i32
    return %c0_i32, %c0_i32_0 : i32, i32
  }
  func.func @transform_9(%arg0: i32) -> (i32, i32) {
    %c0_i32 = arith.constant 0 : i32
    %c0_i32_0 = arith.constant 0 : i32
    %c0_i32_1 = arith.constant 0 : i32
    return %c0_i32, %c0_i32_0 : i32, i32
  }
  func.func @transform_10(%arg0: i32) -> (i32, i32) {
    %c0_i32 = arith.constant 0 : i32
    %c0_i32_0 = arith.constant 0 : i32
    %c0_i32_1 = arith.constant 0 : i32
    return %c0_i32, %c0_i32_0 : i32, i32
  }
  func.func @transform_11(%arg0: i32) -> (i32, i32) {
    %c0_i32 = arith.constant 0 : i32
    %c0_i32_0 = arith.constant 0 : i32
    %c0_i32_1 = arith.constant 0 : i32
    return %c0_i32, %c0_i32_0 : i32, i32
  }
  func.func @transform_12(%arg0: i32) -> (i32, i32) {
    %c0_i32 = arith.constant 0 : i32
    %c0_i32_0 = arith.constant 0 : i32
    %c0_i32_1 = arith.constant 0 : i32
    return %c0_i32, %c0_i32_0 : i32, i32
  }
}

</mosaic_0001>

<bundles_post_ra>
// kernel: tpu_custom_call.1
= control target key start
LH: loop header
LB: loop body
LE: loop exit
PB: predicated region body
PF: predicated region fallthrough
CT: control target
= control target key end

     0   :  { %18 = vsyncpa [#allocation4], 0  ;;  %s2229_s0 = inlined_call_operand.<no memory space> [shape: f32[1,1], index: 0, kind: input, shape index: {}]   ;;  %s2230_s1 = inlined_call_operand.hbm [shape: s32[1,512], index: 1, kind: input, shape index: {}]   ;;  %s2231_s2 = inlined_call_operand.hbm [shape: bf16[512,128], index: 2, kind: input, shape index: {}]   ;;  %s2232_s3 = inlined_call_operand.hbm [shape: f32[64,128], index: 3, kind: input, shape index: {}]   ;;  %s2233_s4 = inlined_call_operand.hbm [shape: bf16[128,256], index: 4, kind: input, shape index: {}]   ;;  %s2234_s5 = inlined_call_operand.vmem [shape: f32[1,256], index: 5, kind: input, shape index: {}]   ;;  %s2235_s6 = inlined_call_operand.vmem [shape: f32[1,256], index: 6, kind: input, shape index: {}]   ;;  %s2236_s7 = inlined_call_operand.vmem [shape: f32[1,256], index: 7, kind: input, shape index: {}]   ;;  %s2237_s8 = inlined_call_operand.hbm [shape: bf16[256,128], index: 8, kind: input, shape index: {}]   ;;  %s2238_s9 = inlined_call_operand.vmem [shape: f32[1,128], index: 9, kind: input, shape index: {}]   ;;  %s2239_s10 = inlined_call_operand.vmem [shape: f32[1,128], index: 10, kind: input, shape index: {}]   ;;  %s2240_s11 = inlined_call_operand.vmem [shape: f32[1,128], index: 11, kind: input, shape index: {}]   ;;  %s2241_s12 = inlined_call_operand.hbm [shape: f32[64,128], index: 12, kind: output, shape index: {}]  }
   0x1   :  { %19 = vsyncpa [#allocation7], 0 }
   0x2   :  { %20 = vsyncpa [#allocation10], 0  ;;  %s39_s23 = sshll.u32 %s2231_s2, 4  ;;  %s40_s23 = int_to_ptr.hbm [resolvable:$true] %s39_s23 }
   0x3   :  { %21 = vsyncpa [#allocation5], 0  ;;  %s1912_s24 = smov [#allocation6]   ;;  %s1913_s26 = smov 64  }
   0x4   :  { %s41_s25 = sshll.u32 %s1912_s24, 4  ;;  %s1914_s27 = smov 4   ;;  %s42_s25 = int_to_ptr.vmem [resolvable:$true] %s41_s25 }
   0x5   :  { %47 = dma.hbm_to_vmem [thread:$0]  %s40_s23, 4096, %s42_s25, [#allocation7], %s1913_s26, %s1913_s26, %s1914_s27  }
   0x6   :  { %s65_s30 = sshll.u32 %s2233_s4, 4  ;;  %s1915_s13 = smov [#allocation9]   ;;  %s66_s30 = int_to_ptr.hbm [resolvable:$true] %s65_s30 }
   0x7   :  { %s67_s14 = sshll.u32 %s1915_s13, 4  ;;  %s29_s16 = sshll.u32 %s2230_s1, 4  ;;  %s68_s14 = int_to_ptr.vmem [resolvable:$true] %s67_s14  ;;  %s30_s16 = int_to_ptr.hbm [resolvable:$true] %s29_s16 }
   0x8   :  { %s1916_s17 = smov 128   ;;  %s1917_s18 = smov 8  }
   0x9   :  { %73 = dma.hbm_to_vmem [thread:$0]  %s66_s30, 2048, %s68_s14, [#allocation10], %s1916_s17, %s1916_s17, %s1917_s18  }
   0xa   :  { %s52_s21 = sshll.u32 %s2232_s3, 4  ;;  %s1918_s4 = smov [#allocation3]   ;;  %s53_s21 = int_to_ptr.hbm [resolvable:$true] %s52_s21 }
   0xb   :  { %s31_s22 = sshll.u32 %s1918_s4, 4  ;;  %s1919_s23 = smov [#allocation8]   ;;  %s32_s22 = int_to_ptr.vmem [resolvable:$true] %s31_s22 }
   0xc   :  { %34 = dma.hbm_to_vmem [thread:$0]  %s30_s16, 64, %s32_s22, [#allocation4]  }
   0xd   :  { %s54_s24 = sshll.u32 %s1919_s23, 4  ;;  %s84_s28 = sshll.u32 %s2237_s8, 4  ;;  %s55_s24 = int_to_ptr.vmem [resolvable:$true] %s54_s24  ;;  %s85_s28 = int_to_ptr.hbm [resolvable:$true] %s84_s28 }
   0xe   :  { %60 = dma.hbm_to_vmem [thread:$0]  %s53_s21, 1024, %s55_s24, [#allocation7], %s1916_s17, %s1916_s17, %s1917_s18  }
   0xf   :  { %s1920_s29 = smov [#allocation11]  }
  0x10   :  { %s86_s30 = sshll.u32 %s1920_s29, 4  ;;  %s87_s30 = int_to_ptr.vmem [resolvable:$true] %s86_s30 }
  0x11   :  { %92 = dma.hbm_to_vmem [thread:$0]  %s85_s28, 2048, %s87_s30, [#allocation10], %s1913_s26, %s1913_s26, %s1914_s27  }
  0x12   :  { %1904 = dma.done.wait [#allocation4], 64  }
  0x13   :  { %1905 = vsyncadd [#allocation4], 4294967232 }
  0x14   :  { %1906 = dma.done.wait [#allocation7], 5120  }
  0x15   :  { %1907 = vsyncadd [#allocation7], 4294962176 }
  0x16   :  { %1908 = dma.done.wait [#allocation10], 4096  }
  0x17   :  { %1909 = vsyncadd [#allocation10], 4294963200  ;;  %v1682_v0 = vld [vmem:[#allocation6 + $0x38] sm:$0xff]  ;;  %v1681_v4 = vld [vmem:[#allocation6 + $0x30] sm:$0xff]  ;;  %v131_v16 = vlaneseq  ;;  %v1921_v40 = vmov 1.0|1.0  }
  0x18   :  { %v1690_v1 = vld [vmem:[#allocation6 + $0x78] sm:$0xff]  ;;  %521 = vmatpush.bf16.msra.mxu0 %v1682_v0  ;;  %v1689_v5 = vld [vmem:[#allocation6 + $0x70] sm:$0xff]  ;;  %v1680_v8 = vld [vmem:[#allocation6 + $0x28] sm:$0xff]  ;;  %s657_s26 = sadd.f32 1.0, %s2229_s0  ;;  %s1340_s4 = sshll.u32 %s2241_s12, 4  ;;  %s1341_s4 = int_to_ptr.hbm [resolvable:$true] %s1340_s4 }
  0x19   :  { %v1698_v2 = vld [vmem:[#allocation6 + $0xb8] sm:$0xff]  ;;  %550 = vmatpush.bf16.msra.mxu1 %v1690_v1  ;;  %v1697_v6 = vld [vmem:[#allocation6 + $0xb0] sm:$0xff]  ;;  %v1688_v9 = vld [vmem:[#allocation6 + $0x68] sm:$0xff]  ;;  %v2015_v21 = vshrl.u32 %v131_v16, 7 }
  0x1a   :  { %v1706_v3 = vld [vmem:[#allocation6 + $0xf8] sm:$0xff]  ;;  %579 = vmatpush.bf16.msra.mxu2 %v1698_v2  ;;  %v1705_v7 = vld [vmem:[#allocation6 + $0xf0] sm:$0xff]  ;;  %v1696_v10 = vld [vmem:[#allocation6 + $0xa8] sm:$0xff] }
  0x1b   :  { %608 = vmatpush.bf16.msra.mxu3 %v1706_v3  ;;  %v1704_v11 = vld [vmem:[#allocation6 + $0xe8] sm:$0xff]  ;;  %v1679_v12 = vld [vmem:[#allocation6 + $0x20] sm:$0xff]  ;;  %v1678_v17 = vld [vmem:[#allocation6 + $0x18] sm:$0xff]  ;;  %v133_v27 = vadd.s32 8, %v2015_v21  ;;  %v134_v41 = vadd.s32 16, %v2015_v21  ;;  %v135_v42 = vadd.s32 24, %v2015_v21 }
  0x1c   :  { %522 = vmatpush.bf16.msra.mxu0 %v1681_v4  ;;  %v1687_v13 = vld [vmem:[#allocation6 + $0x60] sm:$0xff]  ;;  %v1686_v18 = vld [vmem:[#allocation6 + $0x58] sm:$0xff]  ;;  %v1677_v22 = vld [vmem:[#allocation6 + $0x10] sm:$0xff]  ;;  %v136_v45 = vadd.s32 32, %v2015_v21  ;;  %v137_v46 = vadd.s32 40, %v2015_v21 }
  0x1d   :  { %551 = vmatpush.bf16.msra.mxu1 %v1689_v5  ;;  %v1695_v14 = vld [vmem:[#allocation6 + $0xa0] sm:$0xff]  ;;  %v1694_v19 = vld [vmem:[#allocation6 + $0x98] sm:$0xff]  ;;  %v1685_v23 = vld [vmem:[#allocation6 + $0x50] sm:$0xff] }
  0x1e   :  { %580 = vmatpush.bf16.msra.mxu2 %v1697_v6  ;;  %v1703_v15 = vld [vmem:[#allocation6 + $0xe0] sm:$0xff]  ;;  %v1702_v20 = vld [vmem:[#allocation6 + $0xd8] sm:$0xff]  ;;  %v1693_v25 = vld [vmem:[#allocation6 + $0x90] sm:$0xff]  ;;  %v138_v6 = vadd.s32 48, %v2015_v21 }
  0x1f   :  { %609 = vmatpush.bf16.msra.mxu3 %v1705_v7  ;;  %v140_v24 = vld [vmem:[#allocation3] sm:$0xf]  ;;  %v1701_v26 = vld [vmem:[#allocation6 + $0xd0] sm:$0xff]  ;;  %v1676_v29 = vld [vmem:[#allocation6 + $0x8] sm:$0xff]  ;;  %v139_v7 = vadd.s32 56, %v2015_v21 }
  0x20   :  { %523 = vmatpush.bf16.msra.mxu0 %v1680_v8  ;;  %v2018_v28 = vperm.slane %v140_v24, 0  ;;  %v1684_v30 = vld [vmem:[#allocation6 + $0x48] sm:$0xff]  ;;  %v2020_v31 = vperm.slane %v140_v24, 1  ;;  %v2022_v34 = vperm.slane %v140_v24, 2  ;;  %v2024_v35 = vperm.slane %v140_v24, 3  ;;  %v1675_v36 = vld [vmem:[#allocation6] sm:$0xff] }
  0x21   :  { %552 = vmatpush.bf16.msra.mxu1 %v1688_v9  ;;  %v1692_v32 = vld [vmem:[#allocation6 + $0x88] sm:$0xff]  ;;  %v1683_v37 = vld [vmem:[#allocation6 + $0x40] sm:$0xff]  ;;  %v1605_v43 = vld [vmem:[#allocation9 + $0x70] sm:$0xf] }
  0x22   :  { %581 = vmatpush.bf16.msra.mxu2 %v1696_v10  ;;  %v1700_v33 = vld [vmem:[#allocation6 + $0xc8] sm:$0xff]  ;;  %vm145_vm0 = vcmp.eq.s32.totalorder %v2015_v21, %v2018_v28  ;;  %vm149_vm1 = vcmp.eq.s32.totalorder %v133_v27, %v2018_v28  ;;  %vm146_vm2 = vcmp.eq.s32.totalorder %v2015_v21, %v2020_v31  ;;  %vm150_vm3 = vcmp.eq.s32.totalorder %v133_v27, %v2020_v31  ;;  %v1691_v38 = vld [vmem:[#allocation6 + $0x80] sm:$0xff]  ;;  %v1722_v44 = vld [vmem:[#allocation9 + $0x74] sm:$0xf0] }
  0x23   :  { %610 = vmatpush.bf16.msra.mxu3 %v1704_v11  ;;  %v1699_v39 = vld [vmem:[#allocation6 + $0xc0] sm:$0xff]  ;;  %vm147_vm4 = vcmp.eq.s32.totalorder %v2015_v21, %v2022_v34  ;;  %vm151_vm5 = vcmp.eq.s32.totalorder %v133_v27, %v2022_v34  ;;  %vm1515_vm6 = vmpackc.low %vm149_vm1, %vm145_vm0  ;;  %vm148_vm7 = vcmp.eq.s32.totalorder %v2015_v21, %v2024_v35  ;;  %vm152_vm8 = vcmp.eq.s32.totalorder %v133_v27, %v2024_v35  ;;  %v1721_v48 = vld [vmem:[#allocation9 + $0x74] sm:$0xf] }
  0x24   :  { %524 = vmatpush.bf16.msra.mxu0 %v1679_v12  ;;  %vm1523_vm9 = vmpackc.low %vm150_vm3, %vm146_vm2  ;;  %vm153_vm12 = vcmp.eq.s32.totalorder %v134_v41, %v2018_v28  ;;  %vm157_vm13 = vcmp.eq.s32.totalorder %v135_v42, %v2018_v28  ;;  %vm154_vm14 = vcmp.eq.s32.totalorder %v134_v41, %v2020_v31  ;;  %vm158_vm15 = vcmp.eq.s32.totalorder %v135_v42, %v2020_v31  ;;  %v1607_v49 = vld [vmem:[#allocation9 + $0x78] sm:$0xf0]  ;;  %v1597_v51 = vld [vmem:[#allocation9 + $0x60] sm:$0xf] }
  0x25   :  { %553 = vmatpush.bf16.msra.mxu1 %v1687_v13  ;;  %vm1531_vm10 = vmpackc.low %vm151_vm5, %vm147_vm4  ;;  %vm155_vm0 = vcmp.eq.s32.totalorder %v134_v41, %v2022_v34  ;;  %vm159_vm1 = vcmp.eq.s32.totalorder %v135_v42, %v2022_v34  ;;  %vm156_vm3 = vcmp.eq.s32.totalorder %v134_v41, %v2024_v35  ;;  %vm160_vm4 = vcmp.eq.s32.totalorder %v135_v42, %v2024_v35  ;;  %v1720_v52 = vld [vmem:[#allocation9 + $0x64] sm:$0xf0]  ;;  %v1719_v53 = vld [vmem:[#allocation9 + $0x64] sm:$0xf] }
  0x26   :  { %582 = vmatpush.bf16.msra.mxu2 %v1695_v14  ;;  %vm1539_vm11 = vmpackc.low %vm152_vm8, %vm148_vm7  ;;  %v1606_v47 = vor.u32 %v1722_v44, %v1605_v43  ;;  %v1610_v50 = vor.u32 %v1721_v48, %v1607_v49  ;;  %v1598_v54 = vor.u32 %v1720_v52, %v1597_v51  ;;  %v1599_v55 = vld [vmem:[#allocation9 + $0x68] sm:$0xf0]  ;;  %v1589_v57 = vld [vmem:[#allocation9 + $0x50] sm:$0xf]  ;;  %vm161_vm8 = vcmp.eq.s32.totalorder %v136_v45, %v2018_v28 }
  0x27   :  { %611 = vmatpush.bf16.msra.mxu3 %v1703_v15  ;;  %vm1517_vm2 = vmpackc.low %vm157_vm13, %vm153_vm12  ;;  %v1602_v56 = vor.u32 %v1719_v53, %v1599_v55  ;;  %v1718_v58 = vld [vmem:[#allocation9 + $0x54] sm:$0xf0]  ;;  %v1717_v59 = vld [vmem:[#allocation9 + $0x54] sm:$0xf]  ;;  %vm163_vm13 = vcmp.eq.s32.totalorder %v136_v45, %v2022_v34 }
  0x28   :  { %525 = vmatpush.bf16.msra.mxu0 %v1678_v17  ;;  %vm1525_vm5 = vmpackc.low %vm158_vm15, %vm154_vm14  ;;  %v1591_v60 = vld [vmem:[#allocation9 + $0x58] sm:$0xf0]  ;;  %v1590_v61 = vor.u32 %v1718_v58, %v1589_v57  ;;  %vm167_vm14 = vcmp.eq.s32.totalorder %v137_v46, %v2022_v34  ;;  %v1581_v0 = vld [vmem:[#allocation9 + $0x40] sm:$0xf]  ;;  %vm164_vm15 = vcmp.eq.s32.totalorder %v136_v45, %v2024_v35 }
  0x29   :  { %554 = vmatpush.bf16.msra.mxu1 %v1686_v18  ;;  %vm1541_vm7 = vmpackc.low %vm160_vm4, %vm156_vm3  ;;  %v1594_v62 = vor.u32 %v1717_v59, %v1591_v60  ;;  %v1716_v1 = vld [vmem:[#allocation9 + $0x44] sm:$0xf0]  ;;  %v1715_v2 = vld [vmem:[#allocation9 + $0x44] sm:$0xf]  ;;  %vm169_vm4 = vcmp.eq.s32.totalorder %v138_v6, %v2018_v28 }
  0x2a   :  { %583 = vmatpush.bf16.msra.mxu2 %v1694_v19  ;;  %v1583_v3 = vld [vmem:[#allocation9 + $0x48] sm:$0xf0]  ;;  %v1582_v4 = vor.u32 %v1716_v1, %v1581_v0  ;;  %v1573_v8 = vld [vmem:[#allocation9 + $0x30] sm:$0xf]  ;;  %v1714_v9 = vld [vmem:[#allocation9 + $0x34] sm:$0xf0] }
  0x2b   :  { %612 = vmatpush.bf16.msra.mxu3 %v1702_v20  ;;  %v1586_v5 = vor.u32 %v1715_v2, %v1583_v3  ;;  %v1713_v10 = vld [vmem:[#allocation9 + $0x34] sm:$0xf]  ;;  %v1574_v11 = vor.u32 %v1714_v9, %v1573_v8  ;;  %v1575_v12 = vld [vmem:[#allocation9 + $0x38] sm:$0xf0]  ;;  %v1565_v14 = vld [vmem:[#allocation9 + $0x20] sm:$0xf] }
  0x2c   :  { %526 = vmatpush.bf16.msra.mxu0 %v1677_v22  ;;  %v1578_v13 = vor.u32 %v1713_v10, %v1575_v12  ;;  %v1712_v15 = vld [vmem:[#allocation9 + $0x24] sm:$0xf0]  ;;  %v1711_v16 = vld [vmem:[#allocation9 + $0x24] sm:$0xf]  ;;  %v1567_v18 = vld [vmem:[#allocation9 + $0x28] sm:$0xf0] }
  0x2d   :  { %555 = vmatpush.bf16.msra.mxu1 %v1685_v23  ;;  %v1566_v17 = vor.u32 %v1712_v15, %v1565_v14  ;;  %v1570_v19 = vor.u32 %v1711_v16, %v1567_v18  ;;  %v1557_v20 = vld [vmem:[#allocation9 + $0x10] sm:$0xf]  ;;  %v1710_v21 = vld [vmem:[#allocation9 + $0x14] sm:$0xf0]  ;;  %v1709_v22 = vld [vmem:[#allocation9 + $0x14] sm:$0xf] }
  0x2e   :  { %584 = vmatpush.bf16.msra.mxu2 %v1693_v25  ;;  %v1558_v23 = vor.u32 %v1710_v21, %v1557_v20  ;;  %v1559_v24 = vld [vmem:[#allocation9 + $0x18] sm:$0xf0]  ;;  %v1708_v27 = vld [vmem:[#allocation9 + $0x4] sm:$0xf0]  ;;  %v658_v44 = vld [vmem:[#allocation8] sm:$0xff] }
  0x2f   :  { %613 = vmatpush.bf16.msra.mxu3 %v1701_v26  ;;  %v1562_v25 = vor.u32 %v1709_v22, %v1559_v24  ;;  %v1549_v26 = vld [vmem:[#allocation9] sm:$0xf]  ;;  %v660_v2 = vld [vmem:[#allocation8 + $0x10] sm:$0xff]  ;;  %v661_v3 = vld [vmem:[#allocation8 + $0x18] sm:$0xff] }
  0x30   :  { %527 = vmatpush.bf16.msra.mxu0 %v1676_v29  ;;  %v1550_v29 = vor.u32 %v1708_v27, %v1549_v26  ;;  %v663_v24 = vld [vmem:[#allocation8 + $0x28] sm:$0xff] }
  0x31   :  { %556 = vmatpush.bf16.msra.mxu1 %v1684_v30  ;;  %v1551_v30 = vld [vmem:[#allocation9 + $0x8] sm:$0xf0] }
  0x32   :  { %585 = vmatpush.bf16.msra.mxu2 %v1692_v32 }
  0x33   :  { %614 = vmatpush.bf16.msra.mxu3 %v1700_v33 }
  0x34   :  { %528 = vmatpush.bf16.msra.mxu0 %v1675_v36 }
  0x35   :  { %557 = vmatpush.bf16.msra.mxu1 %v1683_v37 }
  0x36   :  { %586 = vmatpush.bf16.msra.mxu2 %v1691_v38 }
  0x37   :  { %615 = vmatpush.bf16.msra.mxu3 %v1699_v39  ;;  %1516 = vmatmul.msk.bf16.vlgmr.msra.gmra.mxu0 %vm1515_vm6, %v1921_v40  ;;  %vm1533_vm6 = vmpackc.low %vm159_vm1, %vm155_vm0  ;;  %vm168_vm0 = vcmp.eq.s32.totalorder %v137_v46, %v2024_v35 }
  0x38   :  { %1524 = vmatmul.msk.bf16.vlgmr.msra.gmra.mxu1 %vm1523_vm9, %v1921_v40  ;;  %797 = vmatpush.bf16.msrb.mxu0 %v1606_v47  ;;  %vm165_vm9 = vcmp.eq.s32.totalorder %v137_v46, %v2018_v28  ;;  %vm1543_vm3 = vmpackc.low %vm168_vm0, %vm164_vm15 }
  0x39   :  { %1532 = vmatmul.msk.bf16.vlgmr.msra.gmra.mxu2 %vm1531_vm10, %v1921_v40  ;;  %826 = vmatpush.bf16.msrb.mxu1 %v1610_v50  ;;  %vm162_vm10 = vcmp.eq.s32.totalorder %v136_v45, %v2020_v31  ;;  %vm2062_vm12 = vmpackc.low %vm165_vm9, %vm161_vm8  ;;  %vm171_vm8 = vcmp.eq.s32.totalorder %v138_v6, %v2022_v34  ;;  %vm175_vm9 = vcmp.eq.s32.totalorder %v139_v7, %v2022_v34  ;;  %v659_v45 = vld [vmem:[#allocation8 + $0x8] sm:$0xff] }
  0x3a   :  { %1540 = vmatmul.msk.bf16.vlgmr.msra.gmra.mxu3 %vm1539_vm11, %v1921_v40  ;;  %vm166_vm11 = vcmp.eq.s32.totalorder %v137_v46, %v2020_v31  ;;  %v2093_v46 = vstv %s657_s26 }
  0x3b   :  { %vm1527_vm1 = vmpackc.low %vm166_vm11, %vm162_vm10  ;;  %vm172_vm11 = vcmp.eq.s32.totalorder %v138_v6, %v2024_v35  ;;  %v667_v51 = vmul.f32 %v2093_v46, %v658_v44  ;;  %v668_v52 = vmul.f32 %v2093_v46, %v659_v45  ;;  %v669_v8 = vmul.f32 %v2093_v46, %v660_v2  ;;  %v665_v44 = vld [vmem:[#allocation8 + $0x38] sm:$0xff] }
  0x3c   :  { %798 = vmatpush.bf16.msrb.mxu0 %v1598_v54  ;;  %v670_v9 = vmul.f32 %v2093_v46, %v661_v3 }
  0x3d   :  { %827 = vmatpush.bf16.msrb.mxu1 %v1602_v56 }
  0x40   :  { %799 = vmatpush.bf16.msrb.mxu0 %v1590_v61 }
  0x41   :  { %828 = vmatpush.bf16.msrb.mxu1 %v1594_v62 }
  0x44   :  { %800 = vmatpush.bf16.msrb.mxu0 %v1582_v4 }
  0x45   :  { %829 = vmatpush.bf16.msrb.mxu1 %v1586_v5 }
  0x47   :  { %1518 = vmatmul.msk.bf16.gmra.mxu0 %vm1517_vm2, %v1921_v40  ;;  %vm1535_vm2 = vmpackc.low %vm167_vm14, %vm163_vm13 }
  0x48   :  { %1526 = vmatmul.msk.bf16.gmra.mxu1 %vm1525_vm5, %v1921_v40  ;;  %vm173_vm5 = vcmp.eq.s32.totalorder %v139_v7, %v2018_v28  ;;  %vm1537_vm14 = vmpackc.low %vm175_vm9, %vm171_vm8  ;;  %801 = vmatpush.bf16.msrb.mxu0 %v1574_v11  ;;  %v1707_v28 = vld [vmem:[#allocation9 + $0x4] sm:$0xf] }
  0x49   :  { %1534 = vmatmul.msk.bf16.gmra.mxu2 %vm1533_vm6, %v1921_v40  ;;  %vm170_vm6 = vcmp.eq.s32.totalorder %v138_v6, %v2020_v31  ;;  %vm1521_vm10 = vmpackc.low %vm173_vm5, %vm169_vm4  ;;  %830 = vmatpush.bf16.msrb.mxu1 %v1578_v13 }
  0x4a   :  { %1542 = vmatmul.msk.bf16.gmra.mxu3 %vm1541_vm7, %v1921_v40  ;;  %vm174_vm7 = vcmp.eq.s32.totalorder %v139_v7, %v2020_v31  ;;  %v1554_v31 = vor.u32 %v1707_v28, %v1551_v30  ;;  %v672_v30 = vmul.f32 %v2093_v46, %v663_v24 }
  0x4b   :  { %vm1529_vm13 = vmpackc.low %vm174_vm7, %vm170_vm6 }
  0x4c   :  { %802 = vmatpush.bf16.msrb.mxu0 %v1566_v17 }
  0x4d   :  { %831 = vmatpush.bf16.msrb.mxu1 %v1570_v19 }
  0x50   :  { %803 = vmatpush.bf16.msrb.mxu0 %v1558_v23  ;;  %v662_v23 = vld [vmem:[#allocation8 + $0x20] sm:$0xff] }
  0x51   :  { %832 = vmatpush.bf16.msrb.mxu1 %v1562_v25 }
  0x54   :  { %804 = vmatpush.bf16.msrb.mxu0 %v1550_v29  ;;  %v671_v29 = vmul.f32 %v2093_v46, %v662_v23 }
  0x55   :  { %833 = vmatpush.bf16.msrb.mxu1 %v1554_v31 }
  0x57   :  { %1520 = vmatmul.msk.bf16.gmra.mxu0 %vm2062_vm12, %v1921_v40  ;;  %vm176_vm12 = vcmp.eq.s32.totalorder %v139_v7, %v2024_v35 }
  0x58   :  { %1528 = vmatmul.msk.bf16.gmra.mxu1 %vm1527_vm1, %v1921_v40  ;;  %vm1545_vm15 = vmpackc.low %vm176_vm12, %vm172_vm11 }
  0x59   :  { %1536 = vmatmul.msk.bf16.gmra.mxu2 %vm1535_vm2, %v1921_v40 }
  0x5a   :  { %1544 = vmatmul.msk.bf16.gmra.mxu3 %vm1543_vm3, %v1921_v40 }
  0x67   :  { %1522 = vmatmul.msk.bf16.gmra.mxu0 %vm1521_vm10, %v1921_v40 }
  0x68   :  { %1530 = vmatmul.msk.bf16.gmra.mxu1 %vm1529_vm13, %v1921_v40 }
  0x69   :  { %1538 = vmatmul.msk.bf16.gmra.mxu2 %vm1537_vm14, %v1921_v40 }
  0x6a   :  { %1546 = vmatmul.msk.bf16.gmra.mxu3 %vm1545_vm15, %v1921_v40 }
  0xb4   :  { %v530_v32 = vpop.f32.mrf.mxu0 }
  0xb5   :  { %v559_v33 = vpop.f32.mrf.mxu1 }
  0xb6   :  { %v560_v34 = vadd.f32 %v559_v33, %v530_v32 }
  0xbc   :  { %v588_v35 = vpop.f32.mrf.mxu2  ;;  %v532_v37 = vpop.f32.mrf.mxu0 }
  0xbd   :  { %v617_v36 = vpop.f32.mrf.mxu3  ;;  %v561_v38 = vpop.f32.mrf.mxu1  ;;  %v589_v39 = vadd.f32 %v588_v35, %v560_v34 }
  0xbe   :  { %v562_v41 = vadd.f32 %v561_v38, %v532_v37 }
  0xbf   :  { %v618_v40 = vadd.f32 %v617_v36, %v589_v39 }
  0xc1   :  { %v683_v54 = vadd.f32 %v667_v51, %v618_v40 }
  0xc4   :  { %v590_v42 = vpop.f32.mrf.mxu2  ;;  %v535_v48 = vpop.f32.mrf.mxu0 }
  0xc5   :  { %v619_v43 = vpop.f32.mrf.mxu3  ;;  %v591_v47 = vadd.f32 %v590_v42, %v562_v41  ;;  %v564_v49 = vpop.f32.mrf.mxu1 }
  0xc6   :  { %v565_v53 = vadd.f32 %v564_v49, %v535_v48 }
  0xc7   :  { %v620_v50 = vadd.f32 %v619_v43, %v591_v47  ;;  %v664_v43 = vld [vmem:[#allocation8 + $0x30] sm:$0xff] }
  0xc8   :  { %v673_v49 = vmul.f32 %v2093_v46, %v664_v43 }
  0xc9   :  { %v684_v55 = vadd.f32 %v668_v52, %v620_v50  ;;  %v674_v50 = vmul.f32 %v2093_v46, %v665_v44 }
  0xcb   :  { %v691_v60 = vpack.c.bf16 %v684_v55, %v683_v54 }
  0xcc   :  { %v593_v56 = vpop.f32.mrf.mxu2  ;;  %v537_v58 = vpop.f32.mrf.mxu0 }
  0xcd   :  { %v622_v57 = vpop.f32.mrf.mxu3  ;;  %v566_v59 = vpop.f32.mrf.mxu1  ;;  %v594_v61 = vadd.f32 %v593_v56, %v565_v53  ;;  %805 = vmatmul.bf16.vlgmr.msrb.gmra.mxu0 %v691_v60  ;;  %834 = vmatmul.bf16.vlgmr.msrb.gmra.mxu1 %v691_v60 }
  0xce   :  { %v567_v63 = vadd.f32 %v566_v59, %v537_v58 }
  0xcf   :  { %v623_v62 = vadd.f32 %v622_v57, %v594_v61 }
  0xd1   :  { %v685_v11 = vadd.f32 %v669_v8, %v623_v62 }
  0xd4   :  { %v595_v0 = vpop.f32.mrf.mxu2  ;;  %v540_v5 = vpop.f32.mrf.mxu0 }
  0xd5   :  { %v624_v1 = vpop.f32.mrf.mxu3  ;;  %v596_v4 = vadd.f32 %v595_v0, %v567_v63  ;;  %v569_v6 = vpop.f32.mrf.mxu1  ;;  %v711_v0 = vld [vmem:[%s2234_s5] sm:$0x3] }
  0xd6   :  { %v570_v10 = vadd.f32 %v569_v6, %v540_v5  ;;  %v713_v2 = vperm.slane %v711_v0, 0  ;;  %v714_v3 = vperm.slane %v711_v0, 1 }
  0xd7   :  { %v625_v7 = vadd.f32 %v624_v1, %v596_v4 }
  0xd9   :  { %v686_v12 = vadd.f32 %v670_v9, %v625_v7 }
  0xdb   :  { %v692_v17 = vpack.c.bf16 %v686_v12, %v685_v11 }
  0xdc   :  { %v598_v13 = vpop.f32.mrf.mxu2  ;;  %v542_v15 = vpop.f32.mrf.mxu0 }
  0xdd   :  { %v627_v14 = vpop.f32.mrf.mxu3  ;;  %v571_v16 = vpop.f32.mrf.mxu1  ;;  %v599_v18 = vadd.f32 %v598_v13, %v570_v10  ;;  %810 = vmatmul.bf16.gmra.mxu0 %v692_v17  ;;  %839 = vmatmul.bf16.gmra.mxu1 %v692_v17 }
  0xde   :  { %v572_v20 = vadd.f32 %v571_v16, %v542_v15 }
  0xdf   :  { %v628_v19 = vadd.f32 %v627_v14, %v599_v18 }
  0xe1   :  { %v687_v32 = vadd.f32 %v671_v29, %v628_v19 }
  0xe4   :  { %v600_v21 = vpop.f32.mrf.mxu2  ;;  %v545_v26 = vpop.f32.mrf.mxu0 }
  0xe5   :  { %v629_v22 = vpop.f32.mrf.mxu3  ;;  %v601_v25 = vadd.f32 %v600_v21, %v572_v20  ;;  %v574_v27 = vpop.f32.mrf.mxu1 }
  0xe6   :  { %v575_v31 = vadd.f32 %v574_v27, %v545_v26 }
  0xe7   :  { %v630_v28 = vadd.f32 %v629_v22, %v601_v25 }
  0xe9   :  { %v688_v33 = vadd.f32 %v672_v30, %v630_v28 }
  0xeb   :  { %v693_v36 = vpack.c.bf16 %v688_v33, %v687_v32 }
  0xec   :  { %v603_v34 = vpop.f32.mrf.mxu2  ;;  %v547_v38 = vpop.f32.mrf.mxu0 }
  0xed   :  { %v632_v35 = vpop.f32.mrf.mxu3  ;;  %v604_v37 = vadd.f32 %v603_v34, %v575_v31  ;;  %815 = vmatmul.bf16.gmra.mxu0 %v693_v36  ;;  %844 = vmatmul.bf16.gmra.mxu1 %v693_v36  ;;  %v576_v39 = vpop.f32.mrf.mxu1 }
  0xee   :  { %v577_v41 = vadd.f32 %v576_v39, %v547_v38 }
  0xef   :  { %v633_v40 = vadd.f32 %v632_v35, %v604_v37 }
  0xf1   :  { %v689_v51 = vadd.f32 %v673_v49, %v633_v40 }
  0xf4   :  { %v605_v42 = vpop.f32.mrf.mxu2 }
  0xf5   :  { %v606_v45 = vadd.f32 %v605_v42, %v577_v41  ;;  %v634_v47 = vpop.f32.mrf.mxu3 }
  0xf7   :  { %v635_v48 = vadd.f32 %v634_v47, %v606_v45 }
  0xf9   :  { %v690_v52 = vadd.f32 %v674_v50, %v635_v48 }
  0xfb   :  { %v694_v53 = vpack.c.bf16 %v690_v52, %v689_v51 }
  0xfd   :  { %820 = vmatmul.bf16.gmra.mxu0 %v694_v53  ;;  %849 = vmatmul.bf16.gmra.mxu1 %v694_v53 }
 0x14a   :  { %v806_v54 = vpop.f32.mrf.mxu0  ;;  %v835_v55 = vpop.f32.mrf.mxu1 }
 0x14b   :  { %v807_v6 = vadd.f32 %v806_v54, %v713_v2  ;;  %v836_v7 = vadd.f32 %v835_v55, %v714_v3 }
 0x152   :  { %v808_v56 = vpop.f32.mrf.mxu0  ;;  %v837_v57 = vpop.f32.mrf.mxu1 }
 0x153   :  { %v809_v4 = vadd.f32 %v808_v56, %v713_v2  ;;  %v838_v5 = vadd.f32 %v837_v57, %v714_v3 }
 0x155   :  { %v855_v10 = vadd.f32 %v809_v4, %v807_v6  ;;  %v868_v11 = vadd.f32 %v838_v5, %v836_v7 }
 0x15a   :  { %v811_v58 = vpop.f32.mrf.mxu0  ;;  %v840_v59 = vpop.f32.mrf.mxu1 }
 0x15b   :  { %v812_v8 = vadd.f32 %v811_v58, %v713_v2  ;;  %v841_v9 = vadd.f32 %v840_v59, %v714_v3 }
 0x15d   :  { %v856_v16 = vadd.f32 %v855_v10, %v812_v8  ;;  %v869_v17 = vadd.f32 %v868_v11, %v841_v9  ;;  %v1729_v10 = vld [vmem:[#allocation11 + $0x30] sm:$0xff] }
 0x15e   :  { %v1737_v11 = vld [vmem:[#allocation11 + $0x70] sm:$0xff] }
 0x162   :  { %v813_v60 = vpop.f32.mrf.mxu0  ;;  %v842_v61 = vpop.f32.mrf.mxu1 }
 0x163   :  { %v814_v12 = vadd.f32 %v813_v60, %v713_v2  ;;  %v843_v13 = vadd.f32 %v842_v61, %v714_v3  ;;  %v1730_v61 = vld [vmem:[#allocation11 + $0x38] sm:$0xff] }
 0x164   :  { %1181 = vmatpush.bf16.msrb.mxu2 %v1730_v61  ;;  %v1732_v61 = vld [vmem:[#allocation11 + $0x48] sm:$0xff] }
 0x165   :  { %v857_v20 = vadd.f32 %v856_v16, %v814_v12  ;;  %v870_v21 = vadd.f32 %v869_v17, %v843_v13 }
 0x168   :  { %1182 = vmatpush.bf16.msrb.mxu2 %v1729_v10 }
 0x16a   :  { %v816_v62 = vpop.f32.mrf.mxu0  ;;  %v845_v63 = vpop.f32.mrf.mxu1 }
 0x16b   :  { %v817_v18 = vadd.f32 %v816_v62, %v713_v2  ;;  %v846_v19 = vadd.f32 %v845_v63, %v714_v3  ;;  %v1738_v62 = vld [vmem:[#allocation11 + $0x78] sm:$0xff] }
 0x16c   :  { %1210 = vmatpush.bf16.msrb.mxu3 %v1738_v62 }
 0x16d   :  { %v858_v24 = vadd.f32 %v857_v20, %v817_v18  ;;  %v871_v25 = vadd.f32 %v870_v21, %v846_v19 }
 0x170   :  { %1211 = vmatpush.bf16.msrb.mxu3 %v1737_v11 }
 0x172   :  { %v818_v46 = vpop.f32.mrf.mxu0  ;;  %v847_v1 = vpop.f32.mrf.mxu1 }
 0x173   :  { %v819_v22 = vadd.f32 %v818_v46, %v713_v2  ;;  %v2106_v23 = vadd.f32 %v847_v1, %v714_v3 }
 0x175   :  { %v859_v28 = vadd.f32 %v858_v24, %v819_v22  ;;  %v872_v29 = vadd.f32 %v871_v25, %v2106_v23  ;;  %v1728_v24 = vld [vmem:[#allocation11 + $0x28] sm:$0xff] }
 0x176   :  { %v1736_v25 = vld [vmem:[#allocation11 + $0x68] sm:$0xff]  ;;  %1183 = vmatpush.bf16.msrb.mxu2 %v1728_v24 }
 0x177   :  { %1212 = vmatpush.bf16.msrb.mxu3 %v1736_v25  ;;  %v981_v25 = vld [vmem:[%s2235_s6] sm:$0x3] }
 0x17a   :  { %v821_v14 = vpop.f32.mrf.mxu0  ;;  %v850_v15 = vpop.f32.mrf.mxu1 }
 0x17b   :  { %v822_v26 = vadd.f32 %v821_v14, %v713_v2  ;;  %v2108_v27 = vadd.f32 %v850_v15, %v714_v3 }
 0x17d   :  { %v860_v32 = vadd.f32 %v859_v28, %v822_v26  ;;  %v873_v33 = vadd.f32 %v872_v29, %v2108_v27 }
 0x182   :  { %v823_v30 = vpop.f32.mrf.mxu0  ;;  %v852_v31 = vpop.f32.mrf.mxu1 }
 0x183   :  { %v824_v34 = vadd.f32 %v823_v30, %v713_v2  ;;  %v2112_v35 = vadd.f32 %v852_v31, %v714_v3 }
 0x185   :  { %v861_v36 = vadd.f32 %v860_v32, %v824_v34  ;;  %v874_v37 = vadd.f32 %v873_v33, %v2112_v35 }
 0x187   :  { %v862_v38 = vrot.slane %v861_v36, 4  ;;  %v875_v39 = vrot.slane %v874_v37, 4 }
 0x189   :  { %v863_v40 = vadd.f32 %v862_v38, %v861_v36  ;;  %v876_v41 = vadd.f32 %v875_v39, %v874_v37  ;;  %v1727_v36 = vld [vmem:[#allocation11 + $0x20] sm:$0xff] }
 0x18a   :  { %1184 = vmatpush.bf16.msrb.mxu2 %v1727_v36 }
 0x18b   :  { %v864_v42 = vrot.slane %v863_v40, 2  ;;  %v877_v43 = vrot.slane %v876_v41, 2 }
 0x18d   :  { %v865_v44 = vadd.f32 %v864_v42, %v863_v40  ;;  %v878_v45 = vadd.f32 %v877_v43, %v876_v41  ;;  %v1734_v43 = vld [vmem:[#allocation11 + $0x58] sm:$0xff] }
 0x18f   :  { %v866_v47 = vrot.slane %v865_v44, 1  ;;  %v879_v48 = vrot.slane %v878_v45, 1 }
 0x191   :  { %v867_v49 = vadd.f32 %v866_v47, %v865_v44  ;;  %v880_v50 = vadd.f32 %v879_v48, %v878_v45 }
 0x193   :  { %v881_v51 = vmul.f32 0.015625, %v867_v49  ;;  %v882_v55 = vmul.f32 0.015625, %v880_v50  ;;  %v1725_v49 = vld [vmem:[#allocation11 + $0x10] sm:$0xff] }
 0x194   :  { %v1733_v50 = vld [vmem:[#allocation11 + $0x50] sm:$0xff] }
 0x195   :  { %v2115_v52 = vsub.f32 %v807_v6, %v881_v51  ;;  %v2117_v53 = vsub.f32 %v809_v4, %v881_v51  ;;  %v2119_v54 = vsub.f32 %v812_v8, %v881_v51  ;;  %v2121_v56 = vsub.f32 %v814_v12, %v881_v51 }
 0x196   :  { %v2127_v59 = vsub.f32 %v817_v18, %v881_v51  ;;  %v2131_v0 = vsub.f32 %v836_v7, %v882_v55  ;;  %v2133_v46 = vsub.f32 %v838_v5, %v882_v55  ;;  %v2135_v1 = vsub.f32 %v841_v9, %v882_v55 }
 0x197   :  { %v899_v57 = vmul.f32 %v2115_v52, %v2115_v52  ;;  %v901_v58 = vmul.f32 %v2117_v53, %v2117_v53  ;;  %v903_v60 = vmul.f32 %v2119_v54, %v2119_v54  ;;  %v2137_v2 = vsub.f32 %v819_v22, %v881_v51 }
 0x198   :  { %v905_v3 = vmul.f32 %v2121_v56, %v2121_v56  ;;  %v2141_v6 = vsub.f32 %v843_v13, %v882_v55  ;;  %v900_v8 = vmul.f32 %v2131_v0, %v2131_v0  ;;  %v902_v7 = vmul.f32 %v2133_v46, %v2133_v46 }
 0x199   :  { %v915_v63 = vadd.f32 %v901_v58, %v899_v57  ;;  %v2147_v5 = vsub.f32 %v822_v26, %v881_v51  ;;  %v907_v9 = vmul.f32 %v2127_v59, %v2127_v59  ;;  %v2151_v14 = vsub.f32 %v846_v19, %v882_v55  ;;  %v1724_v57 = vld [vmem:[#allocation11 + $0x8] sm:$0xff] }
 0x19a   :  { %v904_v13 = vmul.f32 %v2135_v1, %v2135_v1  ;;  %v928_v15 = vadd.f32 %v902_v7, %v900_v8  ;;  %v2155_v16 = vsub.f32 %v824_v34, %v881_v51  ;;  %v909_v17 = vmul.f32 %v2137_v2, %v2137_v2  ;;  %v1731_v7 = vld [vmem:[#allocation11 + $0x40] sm:$0xff] }
 0x19b   :  { %v916_v4 = vadd.f32 %v915_v63, %v903_v60  ;;  %v2160_v20 = vsub.f32 %v2106_v23, %v882_v55  ;;  %v906_v21 = vmul.f32 %v2141_v6, %v2141_v6  ;;  %v911_v19 = vmul.f32 %v2147_v5, %v2147_v5 }
 0x19c   :  { %v929_v22 = vadd.f32 %v928_v15, %v904_v13  ;;  %v2167_v28 = vsub.f32 %v2108_v27, %v882_v55  ;;  %v908_v29 = vmul.f32 %v2151_v14, %v2151_v14  ;;  %v913_v23 = vmul.f32 %v2155_v16, %v2155_v16  ;;  %v1735_v27 = vld [vmem:[#allocation11 + $0x60] sm:$0xff] }
 0x19d   :  { %v917_v12 = vadd.f32 %v916_v4, %v905_v3  ;;  %v2174_v32 = vsub.f32 %v2112_v35, %v882_v55  ;;  %v910_v33 = vmul.f32 %v2160_v20, %v2160_v20  ;;  %1213 = vmatpush.bf16.msrb.mxu3 %v1735_v27  ;;  %v1726_v35 = vld [vmem:[#allocation11 + $0x18] sm:$0xff]  ;;  %v1723_v3 = vld [vmem:[#allocation11] sm:$0xff] }
 0x19e   :  { %v930_v30 = vadd.f32 %v929_v22, %v906_v21  ;;  %v912_v38 = vmul.f32 %v2167_v28, %v2167_v28  ;;  %1185 = vmatpush.bf16.msrb.mxu2 %v1726_v35 }
 0x19f   :  { %v918_v18 = vadd.f32 %v917_v12, %v907_v9  ;;  %v914_v41 = vmul.f32 %v2174_v32, %v2174_v32 }
 0x1a0   :  { %v931_v34 = vadd.f32 %v930_v30, %v908_v29  ;;  %v1003_v30 = vld [vmem:[%s2236_s7] sm:$0x3] }
 0x1a1   :  { %v919_v26 = vadd.f32 %v918_v18, %v909_v17  ;;  %1214 = vmatpush.bf16.msrb.mxu3 %v1734_v43  ;;  %v1005_v27 = vperm.slane %v1003_v30, 0  ;;  %v2192_v43 = vperm.slane %v1003_v30, 1 }
 0x1a2   :  { %v932_v39 = vadd.f32 %v931_v34, %v910_v33  ;;  %1186 = vmatpush.bf16.msrb.mxu2 %v1725_v49 }
 0x1a3   :  { %v920_v31 = vadd.f32 %v919_v26, %v911_v19 }
 0x1a4   :  { %v933_v42 = vadd.f32 %v932_v39, %v912_v38 }
 0x1a5   :  { %v921_v37 = vadd.f32 %v920_v31, %v913_v23  ;;  %1215 = vmatpush.bf16.msrb.mxu3 %v1733_v50  ;;  %v983_v23 = vperm.slane %v981_v25, 0 }
 0x1a6   :  { %v934_v45 = vadd.f32 %v933_v42, %v914_v41  ;;  %1187 = vmatpush.bf16.msrb.mxu2 %v1724_v57  ;;  %v984_v42 = vperm.slane %v981_v25, 1 }
 0x1a7   :  { %v922_v40 = vrot.slane %v921_v37, 4 }
 0x1a8   :  { %v935_v48 = vrot.slane %v934_v45, 4 }
 0x1a9   :  { %v923_v44 = vadd.f32 %v922_v40, %v921_v37  ;;  %1216 = vmatpush.bf16.msrb.mxu3 %v1732_v61 }
 0x1aa   :  { %v936_v55 = vadd.f32 %v935_v48, %v934_v45  ;;  %1188 = vmatpush.bf16.msrb.mxu2 %v1723_v3 }
 0x1ab   :  { %v924_v47 = vrot.slane %v923_v44, 2 }
 0x1ac   :  { %v937_v60 = vrot.slane %v936_v55, 2 }
 0x1ad   :  { %v925_v51 = vadd.f32 %v924_v47, %v923_v44  ;;  %1217 = vmatpush.bf16.msrb.mxu3 %v1731_v7 }
 0x1ae   :  { %v938_v63 = vadd.f32 %v937_v60, %v936_v55 }
 0x1af   :  { %v926_v58 = vrot.slane %v925_v51, 1 }
 0x1b0   :  { %v939_v8 = vrot.slane %v938_v63, 1 }
 0x1b1   :  { %v927_v62 = vadd.f32 %v926_v58, %v925_v51 }
 0x1b2   :  { %v940_v10 = vadd.f32 %v939_v8, %v938_v63 }
 0x1b3   :  { %v941_v4 = vmul.f32 0.015625, %v927_v62 }
 0x1b4   :  { %v942_v11 = vmul.f32 0.015625, %v940_v10 }
 0x1b5   :  { %v943_v9 = vadd.f32 1e-05, %v941_v4 }
 0x1b6   :  { %v944_v12 = vadd.f32 1e-05, %v942_v11 }
 0x1b7   :  { %1754 = vrsqrt.f32 %v943_v9  ;;  %vm951_vm1 = vweird.f32 %v943_v9 }
 0x1b8   :  { %1756 = vrsqrt.f32 %v944_v12  ;;  %vm961_vm4 = vweird.f32 %v944_v12 }
 0x1bd   :  { %v1755_v13 = vpop.eup %1754 }
 0x1be   :  { %v946_v15 = vmul.f32 %v1755_v13, %v943_v9  ;;  %v1757_v18 = vpop.eup %1756  ;;  %vm952_vm0 = vweird.f32 %v1755_v13 }
 0x1bf   :  { %v956_v22 = vmul.f32 %v1757_v18, %v944_v12  ;;  %vm953_vm2 = vmor %vm951_vm1, %vm952_vm0  ;;  %vm962_vm3 = vweird.f32 %v1757_v18 }
 0x1c0   :  { %v947_v17 = vmul.f32 %v1755_v13, %v946_v15  ;;  %vm963_vm5 = vmor %vm961_vm4, %vm962_vm3 }
 0x1c1   :  { %v957_v24 = vmul.f32 %v1757_v18, %v956_v22 }
 0x1c2   :  { %v948_v21 = vmul.f32 0.5, %v947_v17 }
 0x1c3   :  { %v958_v29 = vmul.f32 0.5, %v957_v24 }
 0x1c4   :  { %v949_v19 = vsub.f32 1.5, %v948_v21 }
 0x1c5   :  { %v959_v33 = vsub.f32 1.5, %v958_v29 }
 0x1c6   :  { %v950_v26 = vmul.f32 %v1755_v13, %v949_v19 }
 0x1c7   :  { %v960_v37 = vmul.f32 %v1757_v18, %v959_v33 }
 0x1c8   :  { %v954_v31 = vsel %vm953_vm2, %v1755_v13, %v950_v26 }
 0x1c9   :  { %v965_v34 = vmul.f32 %v954_v31, %v2115_v52  ;;  %v967_v36 = vmul.f32 %v954_v31, %v2117_v53  ;;  %v973_v38 = vmul.f32 %v954_v31, %v2127_v59  ;;  %v975_v39 = vmul.f32 %v954_v31, %v2137_v2 }
 0x1ca   :  { %v964_v35 = vsel %vm963_vm5, %v1757_v18, %v960_v37  ;;  %v969_v48 = vmul.f32 %v954_v31, %v2119_v54  ;;  %v971_v59 = vmul.f32 %v954_v31, %v2121_v56  ;;  %v979_v55 = vmul.f32 %v954_v31, %v2155_v16 }
 0x1cb   :  { %v987_v40 = vmul.f32 %v983_v23, %v965_v34  ;;  %v989_v41 = vmul.f32 %v983_v23, %v967_v36  ;;  %v966_v52 = vmul.f32 %v964_v35, %v2131_v0  ;;  %v995_v47 = vmul.f32 %v983_v23, %v973_v38 }
 0x1cc   :  { %v968_v53 = vmul.f32 %v964_v35, %v2133_v46  ;;  %v997_v49 = vmul.f32 %v983_v23, %v975_v39  ;;  %v977_v0 = vmul.f32 %v954_v31, %v2147_v5  ;;  %v991_v46 = vmul.f32 %v983_v23, %v969_v48 }
 0x1cd   :  { %v1009_v44 = vadd.f32 %v1005_v27, %v987_v40  ;;  %v1011_v45 = vadd.f32 %v1005_v27, %v989_v41  ;;  %v988_v51 = vmul.f32 %v984_v42, %v966_v52  ;;  %v1017_v61 = vadd.f32 %v1005_v27, %v995_v47 }
 0x1ce   :  { %v990_v57 = vmul.f32 %v984_v42, %v968_v53  ;;  %v993_v63 = vmul.f32 %v983_v23, %v971_v59  ;;  %v1019_v54 = vadd.f32 %v1005_v27, %v997_v49  ;;  %v980_v56 = vmul.f32 %v964_v35, %v2174_v32 }
 0x1cf   :  { %v1025_v2 = vmax.f32 %v1009_v44, 0.0  ;;  %v1027_v50 = vmax.f32 %v1011_v45, 0.0  ;;  %v1010_v60 = vadd.f32 %v2192_v43, %v988_v51  ;;  %v1033_v4 = vmax.f32 %v1017_v61, 0.0 }
 0x1d0   :  { %v1012_v62 = vadd.f32 %v2192_v43, %v990_v57  ;;  %v974_v8 = vmul.f32 %v964_v35, %v2151_v14  ;;  %v970_v7 = vmul.f32 %v964_v35, %v2135_v1  ;;  %v1035_v9 = vmax.f32 %v1019_v54, 0.0 }
 0x1d1   :  { %v1041_v58 = vpack.c.bf16 %v1027_v50, %v1025_v2  ;;  %v1026_v3 = vmax.f32 %v1010_v60, 0.0  ;;  %v976_v10 = vmul.f32 %v964_v35, %v2160_v20  ;;  %v972_v5 = vmul.f32 %v964_v35, %v2141_v6 }
 0x1d2   :  { %v1028_v16 = vmax.f32 %v1012_v62, 0.0  ;;  %v996_v11 = vmul.f32 %v984_v42, %v974_v8  ;;  %v999_v12 = vmul.f32 %v983_v23, %v977_v0  ;;  %v1001_v13 = vmul.f32 %v983_v23, %v979_v55 }
 0x1d3   :  { %1189 = vmatmul.bf16.vlgmr.msrb.gmra.mxu2 %v1041_v58  ;;  %v1045_v17 = vpack.c.bf16 %v1035_v9, %v1033_v4  ;;  %v998_v18 = vmul.f32 %v984_v42, %v976_v10  ;;  %v978_v32 = vmul.f32 %v964_v35, %v2167_v28  ;;  %v1013_v21 = vadd.f32 %v1005_v27, %v991_v46  ;;  %v1751_v58 = vld [vmem:[%s2238_s9] ss:$0 sm:$0xff] }
 0x1d4   :  { %v1042_v15 = vpack.c.bf16 %v1028_v16, %v1026_v3  ;;  %v1018_v22 = vadd.f32 %v2192_v43, %v996_v11  ;;  %v1021_v14 = vadd.f32 %v1005_v27, %v999_v12  ;;  %v1023_v19 = vadd.f32 %v1005_v27, %v1001_v13 }
 0x1d5   :  { %v1015_v1 = vadd.f32 %v1005_v27, %v993_v63  ;;  %v1020_v24 = vadd.f32 %v2192_v43, %v998_v18  ;;  %v1000_v20 = vmul.f32 %v984_v42, %v978_v32  ;;  %v1002_v25 = vmul.f32 %v984_v42, %v980_v56 }
 0x1d6   :  { %1218 = vmatmul.bf16.vlgmr.msrb.gmra.mxu3 %v1042_v15  ;;  %v992_v6 = vmul.f32 %v984_v42, %v970_v7  ;;  %v1034_v26 = vmax.f32 %v1018_v22, 0.0  ;;  %v1037_v29 = vmax.f32 %v1021_v14, 0.0  ;;  %v1039_v30 = vmax.f32 %v1023_v19, 0.0 }
 0x1d7   :  { %v994_v23 = vmul.f32 %v984_v42, %v972_v5  ;;  %v1036_v31 = vmax.f32 %v1020_v24, 0.0  ;;  %v1022_v33 = vadd.f32 %v2192_v43, %v1000_v20  ;;  %v1024_v28 = vadd.f32 %v2192_v43, %v1002_v25 }
 0x1d8   :  { %v1047_v34 = vpack.c.bf16 %v1039_v30, %v1037_v29  ;;  %v1029_v39 = vmax.f32 %v1013_v21, 0.0  ;;  %v1031_v27 = vmax.f32 %v1015_v1, 0.0  ;;  %v1014_v40 = vadd.f32 %v2192_v43, %v992_v6 }
 0x1d9   :  { %v1046_v36 = vpack.c.bf16 %v1036_v31, %v1034_v26  ;;  %v1038_v37 = vmax.f32 %v1022_v33, 0.0  ;;  %v1040_v38 = vmax.f32 %v1024_v28, 0.0  ;;  %v1016_v41 = vadd.f32 %v2192_v43, %v994_v23 }
 0x1da   :  { %v1043_v44 = vpack.c.bf16 %v1031_v27, %v1029_v39  ;;  %v1030_v45 = vmax.f32 %v1014_v40, 0.0 }
 0x1db   :  { %v1048_v35 = vpack.c.bf16 %v1040_v38, %v1038_v37  ;;  %v1032_v52 = vmax.f32 %v1016_v41, 0.0 }
 0x1dd   :  { %v1044_v42 = vpack.c.bf16 %v1032_v52, %v1030_v45 }
 0x1e3   :  { %1194 = vmatmul.bf16.gmra.mxu2 %v1043_v44 }
 0x1e6   :  { %1223 = vmatmul.bf16.gmra.mxu3 %v1044_v42 }
 0x1f3   :  { %1199 = vmatmul.bf16.gmra.mxu2 %v1045_v17 }
 0x1f6   :  { %1228 = vmatmul.bf16.gmra.mxu3 %v1046_v36 }
 0x203   :  { %1204 = vmatmul.bf16.gmra.mxu2 %v1047_v34 }
 0x206   :  { %1233 = vmatmul.bf16.gmra.mxu3 %v1048_v35 }
 0x256   :  { %v1190_v47 = vpop.f32.mrf.mxu2 }
 0x257   :  { %v1191_v0 = vadd.f32 %v1751_v58, %v1190_v47 }
 0x259   :  { %v1219_v53 = vpop.f32.mrf.mxu3 }
 0x25a   :  { %v1220_v56 = vadd.f32 %v1219_v53, %v1191_v0 }
 0x25e   :  { %v1192_v48 = vpop.f32.mrf.mxu2 }
 0x25f   :  { %v1193_v60 = vadd.f32 %v1751_v58, %v1192_v48 }
 0x261   :  { %v1221_v59 = vpop.f32.mrf.mxu3 }
 0x262   :  { %v1222_v46 = vadd.f32 %v1221_v59, %v1193_v60 }
 0x264   :  { %v1239_v8 = vadd.f32 %v1222_v46, %v1220_v56 }
 0x266   :  { %v1195_v49 = vpop.f32.mrf.mxu2 }
 0x267   :  { %v1196_v62 = vadd.f32 %v1751_v58, %v1195_v49 }
 0x269   :  { %v1224_v2 = vpop.f32.mrf.mxu3 }
 0x26a   :  { %v1225_v3 = vadd.f32 %v1224_v2, %v1196_v62 }
 0x26c   :  { %v1240_v10 = vadd.f32 %v1239_v8, %v1225_v3 }
 0x26e   :  { %v1197_v50 = vpop.f32.mrf.mxu2 }
 0x26f   :  { %v1198_v63 = vadd.f32 %v1751_v58, %v1197_v50 }
 0x271   :  { %v1226_v51 = vpop.f32.mrf.mxu3 }
 0x272   :  { %v1227_v16 = vadd.f32 %v1226_v51, %v1198_v63 }
 0x274   :  { %v1241_v12 = vadd.f32 %v1240_v10, %v1227_v16  ;;  %v1753_v10 = vld [vmem:[%s2240_s11] ss:$0 sm:$0xff] }
 0x276   :  { %v1200_v43 = vpop.f32.mrf.mxu2 }
 0x277   :  { %v1201_v4 = vadd.f32 %v1751_v58, %v1200_v43 }
 0x279   :  { %v1229_v55 = vpop.f32.mrf.mxu3 }
 0x27a   :  { %v1230_v5 = vadd.f32 %v1229_v55, %v1201_v4 }
 0x27c   :  { %v1242_v17 = vadd.f32 %v1241_v12, %v1230_v5 }
 0x27e   :  { %v1202_v57 = vpop.f32.mrf.mxu2 }
 0x27f   :  { %v1203_v7 = vadd.f32 %v1751_v58, %v1202_v57 }
 0x281   :  { %v1231_v61 = vpop.f32.mrf.mxu3 }
 0x282   :  { %v1232_v13 = vadd.f32 %v1231_v61, %v1203_v7 }
 0x284   :  { %v1243_v21 = vadd.f32 %v1242_v17, %v1232_v13 }
 0x286   :  { %v1205_v54 = vpop.f32.mrf.mxu2 }
 0x287   :  { %v1206_v11 = vadd.f32 %v1751_v58, %v1205_v54 }
 0x289   :  { %v1234_v9 = vpop.f32.mrf.mxu3 }
 0x28a   :  { %v1235_v18 = vadd.f32 %v1234_v9, %v1206_v11 }
 0x28c   :  { %v1244_v14 = vadd.f32 %v1243_v21, %v1235_v18 }
 0x28e   :  { %v1207_v15 = vpop.f32.mrf.mxu2 }
 0x28f   :  { %v1208_v32 = vadd.f32 %v1751_v58, %v1207_v15 }
 0x291   :  { %v1236_v22 = vpop.f32.mrf.mxu3 }
 0x292   :  { %v1237_v19 = vadd.f32 %v1236_v22, %v1208_v32 }
 0x294   :  { %v1245_v1 = vadd.f32 %v1244_v14, %v1237_v19 }
 0x296   :  { %v1246_v24 = vrot.slane %v1245_v1, 4 }
 0x298   :  { %v1247_v20 = vadd.f32 %v1246_v24, %v1245_v1 }
 0x29a   :  { %v1248_v25 = vrot.slane %v1247_v20, 2 }
 0x29c   :  { %v1249_v6 = vadd.f32 %v1248_v25, %v1247_v20 }
 0x29e   :  { %v1250_v26 = vrot.slane %v1249_v6, 1 }
 0x2a0   :  { %v1251_v29 = vadd.f32 %v1250_v26, %v1249_v6 }
 0x2a2   :  { %v1252_v30 = vmul.f32 0.015625, %v1251_v29 }
 0x2a4   :  { %v1253_v23 = vsub.f32 %v1220_v56, %v1252_v30  ;;  %v1254_v31 = vsub.f32 %v1222_v46, %v1252_v30  ;;  %v1255_v33 = vsub.f32 %v1225_v3, %v1252_v30  ;;  %v1256_v28 = vsub.f32 %v1227_v16, %v1252_v30  ;;  %v1752_v3 = vld [vmem:[%s2239_s10] ss:$0 sm:$0xff]  ;;  %s1922_s10 = smov [#allocation12]  }
 0x2a5   :  { %v1257_v37 = vsub.f32 %v1230_v5, %v1252_v30  ;;  %v1258_v27 = vsub.f32 %v1232_v13, %v1252_v30  ;;  %v1259_v35 = vsub.f32 %v1235_v18, %v1252_v30  ;;  %v1260_v52 = vsub.f32 %v1237_v19, %v1252_v30  ;;  %s1338_s11 = sshll.u32 %s1922_s10, 4  ;;  %s1339_s11 = int_to_ptr.vmem [resolvable:$true] %s1338_s11 }
 0x2a6   :  { %v1261_v34 = vmul.f32 %v1253_v23, %v1253_v23  ;;  %v1262_v36 = vmul.f32 %v1254_v31, %v1254_v31  ;;  %v1263_v38 = vmul.f32 %v1255_v33, %v1255_v33  ;;  %v1264_v40 = vmul.f32 %v1256_v28, %v1256_v28 }
 0x2a7   :  { %v1265_v44 = vmul.f32 %v1257_v37, %v1257_v37  ;;  %v1266_v42 = vmul.f32 %v1258_v27, %v1258_v27  ;;  %v1267_v53 = vmul.f32 %v1259_v35, %v1259_v35  ;;  %v1268_v59 = vmul.f32 %v1260_v52, %v1260_v52 }
 0x2a8   :  { %v1269_v39 = vadd.f32 %v1262_v36, %v1261_v34 }
 0x2aa   :  { %v1270_v41 = vadd.f32 %v1269_v39, %v1263_v38 }
 0x2ac   :  { %v1271_v45 = vadd.f32 %v1270_v41, %v1264_v40 }
 0x2ae   :  { %v1272_v47 = vadd.f32 %v1271_v45, %v1265_v44 }
 0x2b0   :  { %v1273_v48 = vadd.f32 %v1272_v47, %v1266_v42 }
 0x2b2   :  { %v1274_v49 = vadd.f32 %v1273_v48, %v1267_v53 }
 0x2b4   :  { %v1275_v2 = vadd.f32 %v1274_v49, %v1268_v59 }
 0x2b6   :  { %v1276_v50 = vrot.slane %v1275_v2, 4 }
 0x2b8   :  { %v1277_v51 = vadd.f32 %v1276_v50, %v1275_v2 }
 0x2ba   :  { %v1278_v43 = vrot.slane %v1277_v51, 2 }
 0x2bc   :  { %v1279_v55 = vadd.f32 %v1278_v43, %v1277_v51 }
 0x2be   :  { %v1280_v57 = vrot.slane %v1279_v55, 1 }
 0x2c0   :  { %v1281_v58 = vadd.f32 %v1280_v57, %v1279_v55 }
 0x2c2   :  { %v1282_v60 = vmul.f32 0.015625, %v1281_v58 }
 0x2c4   :  { %v1283_v61 = vadd.f32 1e-05, %v1282_v60 }
 0x2c6   :  { %1758 = vrsqrt.f32 %v1283_v61  ;;  %vm1290_vm7 = vweird.f32 %v1283_v61 }
 0x2cc   :  { %v1759_v0 = vpop.eup %1758 }
 0x2cd   :  { %v1285_v62 = vmul.f32 %v1759_v0, %v1283_v61  ;;  %vm1291_vm6 = vweird.f32 %v1759_v0 }
 0x2ce   :  { %vm1292_vm8 = vmor %vm1290_vm7, %vm1291_vm6 }
 0x2cf   :  { %v1286_v46 = vmul.f32 %v1759_v0, %v1285_v62 }
 0x2d1   :  { %v1287_v63 = vmul.f32 0.5, %v1286_v46 }
 0x2d3   :  { %v1288_v54 = vsub.f32 1.5, %v1287_v63 }
 0x2d5   :  { %v1289_v56 = vmul.f32 %v1759_v0, %v1288_v54 }
 0x2d7   :  { %v1293_v4 = vsel %vm1292_vm8, %v1759_v0, %v1289_v56 }
 0x2d8   :  { %v1294_v8 = vmul.f32 %v1293_v4, %v1253_v23  ;;  %v1295_v16 = vmul.f32 %v1293_v4, %v1254_v31  ;;  %v1296_v7 = vmul.f32 %v1293_v4, %v1255_v33  ;;  %v1297_v9 = vmul.f32 %v1293_v4, %v1256_v28 }
 0x2d9   :  { %v1298_v5 = vmul.f32 %v1293_v4, %v1257_v37  ;;  %v1299_v11 = vmul.f32 %v1293_v4, %v1258_v27  ;;  %v1300_v12 = vmul.f32 %v1293_v4, %v1259_v35  ;;  %v1301_v13 = vmul.f32 %v1293_v4, %v1260_v52 }
 0x2da   :  { %v1306_v15 = vmul.f32 %v1752_v3, %v1294_v8  ;;  %v1307_v17 = vmul.f32 %v1752_v3, %v1295_v16  ;;  %v1308_v18 = vmul.f32 %v1752_v3, %v1296_v7  ;;  %v1309_v14 = vmul.f32 %v1752_v3, %v1297_v9 }
 0x2db   :  { %v1311_v32 = vmul.f32 %v1752_v3, %v1299_v11  ;;  %v1312_v21 = vmul.f32 %v1752_v3, %v1300_v12  ;;  %v1313_v22 = vmul.f32 %v1752_v3, %v1301_v13  ;;  %v1310_v1 = vmul.f32 %v1752_v3, %v1298_v5 }
 0x2dc   :  { %v1318_v19 = vadd.f32 %v1753_v10, %v1306_v15  ;;  %v1319_v6 = vadd.f32 %v1753_v10, %v1307_v17  ;;  %v1320_v26 = vadd.f32 %v1753_v10, %v1308_v18  ;;  %v1321_v29 = vadd.f32 %v1753_v10, %v1309_v14 }
 0x2dd   :  { %v1323_v24 = vadd.f32 %v1753_v10, %v1311_v32  ;;  %v1324_v20 = vadd.f32 %v1753_v10, %v1312_v21  ;;  %v1325_v25 = vadd.f32 %v1753_v10, %v1313_v22  ;;  %v1322_v30 = vadd.f32 %v1753_v10, %v1310_v1 }
 0x2de   :  { %1326 = vst [vmem:[#allocation12] sm:$0xff] %v1318_v19 }
 0x2df   :  { %1331 = vst [vmem:[#allocation12 + $0x28] sm:$0xff] %v1323_v24 }
 0x2e0   :  { %1332 = vst [vmem:[#allocation12 + $0x30] sm:$0xff] %v1324_v20 }
 0x2e1   :  { %1333 = vst [vmem:[#allocation12 + $0x38] sm:$0xff] %v1325_v25 }
 0x2e2   :  { %1327 = vst [vmem:[#allocation12 + $0x8] sm:$0xff] %v1319_v6 }
 0x2e3   :  { %1328 = vst [vmem:[#allocation12 + $0x10] sm:$0xff] %v1320_v26 }
 0x2e4   :  { %1329 = vst [vmem:[#allocation12 + $0x18] sm:$0xff] %v1321_v29 }
 0x2e5   :  { %1330 = vst [vmem:[#allocation12 + $0x20] sm:$0xff] %v1322_v30 }
 0x2e6   :  { %1346 = dma.vmem_to_hbm [thread:$0]  %s1339_s11, 1024, %s1341_s4, [#allocation5], %s1916_s17, %s1916_s17, %s1917_s18  }
 0x2e7   :  { %1910 = dma.done.wait [#allocation5], 1024  }
 0x2e8   :  { %1911 = vsyncadd [#allocation5], 4294966272 }
 0x2e9   :  { %1351 = vsyncpa [#allocation4], 1 }
 0x2ea   :  { %1352 = vsyncpa [#allocation7], 1 }
 0x2eb   :  { %1353 = vsyncpa [#allocation10], 1 }
 0x2ec   :  { %1354 = vsyncpa [#allocation5], 1 }

</bundles_post_ra>
